<compile_context>
chip_gen: v7x
topology: tpu7x:2x2x1
jax: 0.10.0
libtpu: 0.0.40
codegen_flags: <defaults>
</compile_context>

<pallas_src>
import jax
import jax.numpy as jnp
from jax.experimental import pallas as pl
from jax.experimental.pallas import tpu as pltpu

# Set to jnp.bfloat16 on v5e/v6e/v7x to roughly double MXU throughput and
# halve weight DMA bytes (f32 accumulation kept via preferred_element_type).
# Kept f32 here to match the PyTorch reference numerics exactly.
MATMUL_DTYPE = jnp.float32


def _pick_tile(n, max_tile):
    """Largest divisor of n <= max_tile, preferring multiples of 8 (sublane-aligned)."""
    if n <= max_tile:
        return n
    fallback = 1
    for t in range(max_tile, 0, -1):
        if n % t == 0:
            if t % 8 == 0:
                return t
            if fallback == 1:
                fallback = t
    return fallback


# ----------------------------------------------------------------------------
# LSTM recurrence with fused input projection.
# Grid over chunks of T timesteps; h/c live in VMEM scratch.
# Per step:  gates = x_t @ W_ih + h_prev @ W_hh + b  -> gate nonlinearities.
# ----------------------------------------------------------------------------
def lstm_kernel(emb_ref, wih_ref, whh_ref, b_ref, h0_ref, c0_ref,
                out_ref, hN_ref, cN_ref,
                h_sc, c_sc):
    t = pl.program_id(0)

    @pl.when(t == 0)
    def _():
        h_sc[...] = h0_ref[...]
        c_sc[...] = c0_ref[...]

    T = emb_ref.shape[0]
    H = h_sc.shape[-1]
    # Weights / bias loaded once per chunk (VMEM resident across the grid).
    wih = wih_ref[...].astype(MATMUL_DTYPE)
    whh = whh_ref[...].astype(MATMUL_DTYPE)
    bias = b_ref[...]

    h = h_sc[...]
    c = c_sc[...]
    # Statically-unrolled chunk of T steps: amortizes grid-step overhead and
    # lets the scheduler hoist the h-independent x_t @ W_ih matmuls off the
    # serial critical path.
    for tau in range(T):
        gx = jnp.dot(emb_ref[tau].astype(MATMUL_DTYPE), wih,
                     preferred_element_type=jnp.float32)
        gh = jnp.dot(h.astype(MATMUL_DTYPE), whh,
                     preferred_element_type=jnp.float32)
        gates = gx + gh + bias                     # (B, 4H)
        i_g = jax.nn.sigmoid(gates[:, 0 * H:1 * H])
        f_g = jax.nn.sigmoid(gates[:, 1 * H:2 * H])
        g_g = jnp.tanh(gates[:, 2 * H:3 * H])
        o_g = jax.nn.sigmoid(gates[:, 3 * H:4 * H])
        c = f_g * c + i_g * g_g
        h = o_g * jnp.tanh(c)
        # Batch-major output block (B, T, H): write step tau's hidden state.
        out_ref[:, tau:tau + 1, :] = h[:, None, :].astype(out_ref.dtype)

    h_sc[...] = h
    c_sc[...] = c

    # Final states: written only on the last grid step (no per-step stores).
    @pl.when(t == pl.num_programs(0) - 1)
    def _():
        hN_ref[...] = h.astype(hN_ref.dtype)
        cN_ref[...] = c.astype(cN_ref.dtype)


def run_lstm(emb_tm, w_ih, w_hh, b_lstm, h0, c0, *, chunk_t):
    """emb_tm: (S, B, E) time-major; returns ((B, S, H), (B, H), (B, H))."""
    S, B, E = emb_tm.shape
    H = w_hh.shape[0]
    G = 4 * H
    assert S % chunk_t == 0
    out_shapes = (
        jax.ShapeDtypeStruct((B, S, H), jnp.float32),  # batch-major hidden states
        jax.ShapeDtypeStruct((B, H), jnp.float32),     # h_n
        jax.ShapeDtypeStruct((B, H), jnp.float32),     # c_n
    )
    return pl.pallas_call(
        lstm_kernel,
        out_shape=out_shapes,
        grid_spec=pltpu.PrefetchScalarGridSpec(
            num_scalar_prefetch=0,
            grid=(S // chunk_t,),
            in_specs=[
                pl.BlockSpec((chunk_t, B, E), lambda t: (t, 0, 0)),
                pl.BlockSpec((E, G), lambda t: (0, 0)),   # W_ih: VMEM resident
                pl.BlockSpec((H, G), lambda t: (0, 0)),   # W_hh: VMEM resident
                pl.BlockSpec((1, G), lambda t: (0, 0)),   # combined bias
                pl.BlockSpec((B, H), lambda t: (0, 0)),   # h0
                pl.BlockSpec((B, H), lambda t: (0, 0)),   # c0
            ],
            out_specs=[
                pl.BlockSpec((B, chunk_t, H), lambda t: (0, t, 0)),
                pl.BlockSpec((B, H), lambda t: (0, 0)),
                pl.BlockSpec((B, H), lambda t: (0, 0)),
            ],
            scratch_shapes=[
                pltpu.VMEM((B, H), jnp.float32),
                pltpu.VMEM((B, H), jnp.float32),
            ],
        ),
        compiler_params=pltpu.CompilerParams(
            dimension_semantics=("arbitrary",)),          # sequential recurrence
    )(emb_tm, w_ih, w_hh, b_lstm, h0, c0)


# ----------------------------------------------------------------------------
# Head: LayerNorm -> Linear -> LogSoftmax, fused, row-tiled.
# ----------------------------------------------------------------------------
def head_kernel(x_ref, gamma_ref, beta_ref, w_ref, b_ref, out_ref):
    x = x_ref[...]                                          # (tile_n, H)
    mean = jnp.mean(x, axis=-1, keepdims=True)
    var = jnp.mean((x - mean) ** 2, axis=-1, keepdims=True)
    xn = (x - mean) * jax.lax.rsqrt(var + 1e-5)
    xn = xn * gamma_ref[...] + beta_ref[...]

    logits = (jnp.dot(xn.astype(MATMUL_DTYPE), w_ref[...].astype(MATMUL_DTYPE),
                      preferred_element_type=jnp.float32)
              + b_ref[...])                                 # (tile_n, V)

    m = jnp.max(logits, axis=-1, keepdims=True)
    z = logits - m
    lse = jnp.log(jnp.sum(jnp.exp(z), axis=-1, keepdims=True))
    out_ref[...] = (z - lse).astype(out_ref.dtype)


def run_head(feats, gamma, beta, w_fc, b_fc, *, max_tile_rows=256):
    """feats: (N, H); returns log-probs (N, V)."""
    N, H = feats.shape
    V = w_fc.shape[1]
    tile_n = _pick_tile(N, max_tile_rows)
    return pl.pallas_call(
        head_kernel,
        out_shape=jax.ShapeDtypeStruct((N, V), jnp.float32),
        grid_spec=pltpu.PrefetchScalarGridSpec(
            num_scalar_prefetch=0,
            grid=(N // tile_n,),
            in_specs=[
                pl.BlockSpec((tile_n, H), lambda i: (i, 0)),
                pl.BlockSpec((1, H), lambda i: (0, 0)),
                pl.BlockSpec((1, H), lambda i: (0, 0)),
                pl.BlockSpec((H, V), lambda i: (0, 0)),   # W_fc: VMEM resident
                pl.BlockSpec((1, V), lambda i: (0, 0)),
            ],
            out_specs=pl.BlockSpec((tile_n, V), lambda i: (i, 0)),
        ),
        compiler_params=pltpu.CompilerParams(
            dimension_semantics=("parallel",)),
    )(feats, gamma, beta, w_fc, b_fc)


# ----------------------------------------------------------------------------
# Full forward (glue: embedding gather + free reshapes only, no transposes).
# ----------------------------------------------------------------------------
@jax.jit
def lstm_language_model_forward(tokens, params, hidden=None):
    B, S = tokens.shape
    H = params["w_hh"].shape[0]

    # Embedding lookup, gathered directly time-major (S, B, E).
    emb_tm = jnp.take(params["embedding"], tokens.T, axis=0)

    if hidden is None:
        h0 = jnp.zeros((B, H), jnp.float32)
        c0 = jnp.zeros((B, H), jnp.float32)
    else:
        h0 = hidden[0][0].astype(jnp.float32)
        c0 = hidden[1][0].astype(jnp.float32)

    chunk_t = _pick_tile(S, 32)
    outs, h_n, c_n = run_lstm(emb_tm, params["w_ih"], params["w_hh"],
                              params["b_lstm"], h0, c0, chunk_t=chunk_t)  # (B, S, H)

    feats = outs.reshape(B * S, H)       # batch-major rows; free reshape, no transpose
    log_probs = run_head(feats, params["ln_gamma"], params["ln_beta"],
                         params["w_fc"], params["b_fc"])    # (B*S, V)

    hidden_out = (h_n[None, :, :], c_n[None, :, :])         # (num_layers=1, B, H)
    return log_probs, hidden_out


def init_params(key, vocab_size, embed_size, hidden_size):
    keys = jax.random.split(key, 8)
    s = 0.1
    # Combined LSTM bias = b_ih + b_hh (PyTorch has both; their sum is equivalent).
    return {
        "embedding": s * jax.random.normal(keys[0], (vocab_size, embed_size), jnp.float32),
        "w_ih":      s * jax.random.normal(keys[1], (embed_size, 4 * hidden_size), jnp.float32),
        "w_hh":      s * jax.random.normal(keys[2], (hidden_size, 4 * hidden_size), jnp.float32),
        "b_lstm":    s * jax.random.normal(keys[3], (1, 4 * hidden_size), jnp.float32),
        "ln_gamma":  jnp.ones((1, hidden_size), jnp.float32),
        "ln_beta":   jnp.zeros((1, hidden_size), jnp.float32),
        "w_fc":      s * jax.random.normal(keys[4], (hidden_size, vocab_size), jnp.float32),
        "b_fc":      s * jax.random.normal(keys[5], (1, vocab_size), jnp.float32),
    }


if __name__ == "__main__":
    VOCAB, EMBED, HIDDEN = 128, 16, 32
    BATCH, SEQ = 2, 8

    key = jax.random.PRNGKey(0)
    k_tok, k_par = jax.random.split(key)
    params = init_params(k_par, VOCAB, EMBED, HIDDEN)
    tokens = jax.random.randint(k_tok, (BATCH, SEQ), 0, VOCAB, dtype=jnp.int32)

    log_probs, (h_n, c_n) = lstm_language_model_forward(tokens, params)
    jax.block_until_ready((log_probs, h_n, c_n))

    assert log_probs.shape == (BATCH * SEQ, VOCAB)
    assert h_n.shape == (1, BATCH, HIDDEN) and c_n.shape == (1, BATCH, HIDDEN)
    # log-softmax rows should sum (in prob space) to ~1
    assert bool(jnp.allclose(jnp.sum(jnp.exp(log_probs), axis=-1), 1.0, atol=1e-4))

    print("KERNEL_OK")
</pallas_src>

<mosaic_0001>
module attributes {stable_mosaic.version = 11 : i64} {
  func.func @head_kernel(%arg0: i32, %arg1: memref<16x32xf32, #tpu.memory_space<vmem>>, %arg2: memref<1x32xf32, #tpu.memory_space<vmem>>, %arg3: memref<1x32xf32, #tpu.memory_space<vmem>>, %arg4: memref<32x128xf32, #tpu.memory_space<vmem>>, %arg5: memref<1x128xf32, #tpu.memory_space<vmem>>, %arg6: memref<16x128xf32, #tpu.memory_space<vmem>>) attributes {dimension_semantics = [#tpu.dimension_semantics<parallel>], iteration_bounds = array<i64: 1>, scalar_prefetch = 0 : i64, scratch_operands = 0 : i64, tpu.core_type = #tpu.core_type<tc>, window_params = [{transform_indices = @transform_0, window_bounds = array<i64: 16, 32>}, {pipeline_mode = #tpu.pipeline_mode<synchronous>, transform_indices = @transform_1, window_bounds = array<i64: 1, 32>}, {pipeline_mode = #tpu.pipeline_mode<synchronous>, transform_indices = @transform_2, window_bounds = array<i64: 1, 32>}, {pipeline_mode = #tpu.pipeline_mode<synchronous>, transform_indices = @transform_3, window_bounds = array<i64: 32, 128>}, {pipeline_mode = #tpu.pipeline_mode<synchronous>, transform_indices = @transform_4, window_bounds = array<i64: 1, 128>}, {transform_indices = @transform_5, window_bounds = array<i64: 16, 128>}]} {
    %c0 = arith.constant 0 : index
    %c0_0 = arith.constant 0 : index
    %0 = vector.load %arg1[%c0, %c0_0] : memref<16x32xf32, #tpu.memory_space<vmem>>, vector<16x32xf32>
    %cst = arith.constant dense<0.000000e+00> : vector<16xf32>
    %1 = vector.multi_reduction <add>, %0, %cst [1] : vector<16x32xf32> to vector<16xf32>
    %2 = vector.shape_cast %1 : vector<16xf32> to vector<16x1xf32>
    %cst_1 = arith.constant 3.200000e+01 : f32
    %3 = vector.broadcast %cst_1 : f32 to vector<16x1xf32>
    %4 = arith.divf %2, %3 : vector<16x1xf32>
    %5 = vector.broadcast %4 : vector<16x1xf32> to vector<16x32xf32>
    %6 = arith.subf %0, %5 : vector<16x32xf32>
    %7 = arith.mulf %6, %6 : vector<16x32xf32>
    %cst_2 = arith.constant dense<0.000000e+00> : vector<16xf32>
    %8 = vector.multi_reduction <add>, %7, %cst_2 [1] : vector<16x32xf32> to vector<16xf32>
    %9 = vector.shape_cast %8 : vector<16xf32> to vector<16x1xf32>
    %cst_3 = arith.constant 3.200000e+01 : f32
    %10 = vector.broadcast %cst_3 : f32 to vector<16x1xf32>
    %11 = arith.divf %9, %10 : vector<16x1xf32>
    %12 = vector.broadcast %4 : vector<16x1xf32> to vector<16x32xf32>
    %13 = arith.subf %0, %12 : vector<16x32xf32>
    %cst_4 = arith.constant 9.99999974E-6 : f32
    %14 = vector.broadcast %cst_4 : f32 to vector<16x1xf32>
    %15 = arith.addf %11, %14 : vector<16x1xf32>
    %16 = math.rsqrt %15 : vector<16x1xf32>
    %17 = vector.broadcast %16 : vector<16x1xf32> to vector<16x32xf32>
    %18 = arith.mulf %13, %17 : vector<16x32xf32>
    %c0_5 = arith.constant 0 : index
    %c0_6 = arith.constant 0 : index
    %19 = vector.load %arg2[%c0_5, %c0_6] : memref<1x32xf32, #tpu.memory_space<vmem>>, vector<1x32xf32>
    %20 = vector.broadcast %19 : vector<1x32xf32> to vector<16x32xf32>
    %21 = arith.mulf %18, %20 : vector<16x32xf32>
    %c0_7 = arith.constant 0 : index
    %c0_8 = arith.constant 0 : index
    %22 = vector.load %arg3[%c0_7, %c0_8] : memref<1x32xf32, #tpu.memory_space<vmem>>, vector<1x32xf32>
    %23 = vector.broadcast %22 : vector<1x32xf32> to vector<16x32xf32>
    %24 = arith.addf %21, %23 : vector<16x32xf32>
    %c0_9 = arith.constant 0 : index
    %c0_10 = arith.constant 0 : index
    %25 = vector.load %arg4[%c0_9, %c0_10] : memref<32x128xf32, #tpu.memory_space<vmem>>, vector<32x128xf32>
    %cst_11 = arith.constant dense<0.000000e+00> : vector<16x128xf32>
    %26 = tpu.matmul %24, %25, %cst_11 {dimension_numbers = #tpu.dot_dimension_numbers<[1], [0], [0], [1], [0, 0, 1, 1], [], []>} : vector<16x32xf32>, vector<32x128xf32>, vector<16x128xf32> -> vector<16x128xf32>
    %c0_12 = arith.constant 0 : index
    %c0_13 = arith.constant 0 : index
    %27 = vector.load %arg5[%c0_12, %c0_13] : memref<1x128xf32, #tpu.memory_space<vmem>>, vector<1x128xf32>
    %28 = vector.broadcast %27 : vector<1x128xf32> to vector<16x128xf32>
    %29 = arith.addf %26, %28 : vector<16x128xf32>
    %cst_14 = arith.constant dense<0xFF800000> : vector<16xf32>
    %30 = vector.multi_reduction <maximumf>, %29, %cst_14 [1] : vector<16x128xf32> to vector<16xf32>
    %31 = vector.shape_cast %30 : vector<16xf32> to vector<16x1xf32>
    %32 = vector.broadcast %31 : vector<16x1xf32> to vector<16x128xf32>
    %33 = arith.subf %29, %32 : vector<16x128xf32>
    %34 = math.exp %33 : vector<16x128xf32>
    %cst_15 = arith.constant dense<0.000000e+00> : vector<16xf32>
    %35 = vector.multi_reduction <add>, %34, %cst_15 [1] : vector<16x128xf32> to vector<16xf32>
    %36 = vector.shape_cast %35 : vector<16xf32> to vector<16x1xf32>
    %37 = math.log %36 : vector<16x1xf32>
    %38 = vector.broadcast %37 : vector<16x1xf32> to vector<16x128xf32>
    %39 = arith.subf %33, %38 : vector<16x128xf32>
    %c0_16 = arith.constant 0 : index
    %c0_17 = arith.constant 0 : index
    %40 = vector.load %arg6[%c0_16, %c0_17] : memref<16x128xf32, #tpu.memory_space<vmem>>, vector<16x128xf32>
    tpu.vector_store %arg6[%c0_16, %c0_17], %39 {strides = array<i32>} : memref<16x128xf32, #tpu.memory_space<vmem>>, vector<16x128xf32>,
    return
  }
  func.func @transform_0(%arg0: i32) -> (i32, i32) {
    %c0_i32 = arith.constant 0 : i32
    %c0_i32_0 = arith.constant 0 : i32
    return %arg0, %c0_i32 : i32, i32
  }
  func.func @transform_1(%arg0: i32) -> (i32, i32) {
    %c0_i32 = arith.constant 0 : i32
    %c0_i32_0 = arith.constant 0 : i32
    %c0_i32_1 = arith.constant 0 : i32
    return %c0_i32, %c0_i32_0 : i32, i32
  }
  func.func @transform_2(%arg0: i32) -> (i32, i32) {
    %c0_i32 = arith.constant 0 : i32
    %c0_i32_0 = arith.constant 0 : i32
    %c0_i32_1 = arith.constant 0 : i32
    return %c0_i32, %c0_i32_0 : i32, i32
  }
  func.func @transform_3(%arg0: i32) -> (i32, i32) {
    %c0_i32 = arith.constant 0 : i32
    %c0_i32_0 = arith.constant 0 : i32
    %c0_i32_1 = arith.constant 0 : i32
    return %c0_i32, %c0_i32_0 : i32, i32
  }
  func.func @transform_4(%arg0: i32) -> (i32, i32) {
    %c0_i32 = arith.constant 0 : i32
    %c0_i32_0 = arith.constant 0 : i32
    %c0_i32_1 = arith.constant 0 : i32
    return %c0_i32, %c0_i32_0 : i32, i32
  }
  func.func @transform_5(%arg0: i32) -> (i32, i32) {
    %c0_i32 = arith.constant 0 : i32
    %c0_i32_0 = arith.constant 0 : i32
    return %arg0, %c0_i32 : i32, i32
  }
}

module attributes {stable_mosaic.version = 11 : i64} {
  func.func @lstm_kernel(%arg0: i32, %arg1: memref<8x2x16xf32, #tpu.memory_space<vmem>>, %arg2: memref<16x128xf32, #tpu.memory_space<vmem>>, %arg3: memref<32x128xf32, #tpu.memory_space<vmem>>, %arg4: memref<1x128xf32, #tpu.memory_space<vmem>>, %arg5: memref<2x32xf32, #tpu.memory_space<vmem>>, %arg6: memref<2x32xf32, #tpu.memory_space<vmem>>, %arg7: memref<2x8x32xf32, #tpu.memory_space<vmem>>, %arg8: memref<2x32xf32, #tpu.memory_space<vmem>>, %arg9: memref<2x32xf32, #tpu.memory_space<vmem>>, %arg10: memref<2x32xf32, #tpu.memory_space<vmem>>, %arg11: memref<2x32xf32, #tpu.memory_space<vmem>>) attributes {dimension_semantics = [#tpu.dimension_semantics<arbitrary>], iteration_bounds = array<i64: 1>, scalar_prefetch = 0 : i64, scratch_operands = 2 : i64, tpu.core_type = #tpu.core_type<tc>, window_params = [{transform_indices = @transform_0, window_bounds = array<i64: 8, 2, 16>}, {pipeline_mode = #tpu.pipeline_mode<synchronous>, transform_indices = @transform_1, window_bounds = array<i64: 16, 128>}, {pipeline_mode = #tpu.pipeline_mode<synchronous>, transform_indices = @transform_2, window_bounds = array<i64: 32, 128>}, {pipeline_mode = #tpu.pipeline_mode<synchronous>, transform_indices = @transform_3, window_bounds = array<i64: 1, 128>}, {pipeline_mode = #tpu.pipeline_mode<synchronous>, transform_indices = @transform_4, window_bounds = array<i64: 2, 32>}, {pipeline_mode = #tpu.pipeline_mode<synchronous>, transform_indices = @transform_5, window_bounds = array<i64: 2, 32>}, {transform_indices = @transform_6, window_bounds = array<i64: 2, 8, 32>}, {pipeline_mode = #tpu.pipeline_mode<synchronous>, transform_indices = @transform_7, window_bounds = array<i64: 2, 32>}, {pipeline_mode = #tpu.pipeline_mode<synchronous>, transform_indices = @transform_8, window_bounds = array<i64: 2, 32>}]} {
    %c0_i32 = arith.constant 0 : i32
    %0 = arith.cmpi eq, %arg0, %c0_i32 : i32
    %1 = arith.extui %0 : i1 to i32
    %c0_i32_0 = arith.constant 0 : i32
    %2 = arith.cmpi ne, %1, %c0_i32_0 : i32
    scf.if %2 {
      %c0_96 = arith.constant 0 : index
      %c0_97 = arith.constant 0 : index
      %285 = vector.load %arg5[%c0_96, %c0_97] : memref<2x32xf32, #tpu.memory_space<vmem>>, vector<2x32xf32>
      %c0_98 = arith.constant 0 : index
      %c0_99 = arith.constant 0 : index
      %286 = vector.load %arg10[%c0_98, %c0_99] : memref<2x32xf32, #tpu.memory_space<vmem>>, vector<2x32xf32>
      tpu.vector_store %arg10[%c0_98, %c0_99], %285 {strides = array<i32>} : memref<2x32xf32, #tpu.memory_space<vmem>>, vector<2x32xf32>,
      %c0_100 = arith.constant 0 : index
      %c0_101 = arith.constant 0 : index
      %287 = vector.load %arg6[%c0_100, %c0_101] : memref<2x32xf32, #tpu.memory_space<vmem>>, vector<2x32xf32>
      %c0_102 = arith.constant 0 : index
      %c0_103 = arith.constant 0 : index
      %288 = vector.load %arg11[%c0_102, %c0_103] : memref<2x32xf32, #tpu.memory_space<vmem>>, vector<2x32xf32>
      tpu.vector_store %arg11[%c0_102, %c0_103], %287 {strides = array<i32>} : memref<2x32xf32, #tpu.memory_space<vmem>>, vector<2x32xf32>,
    } else {
    }
    %c0 = arith.constant 0 : index
    %c0_1 = arith.constant 0 : index
    %3 = vector.load %arg2[%c0, %c0_1] : memref<16x128xf32, #tpu.memory_space<vmem>>, vector<16x128xf32>
    %c0_2 = arith.constant 0 : index
    %c0_3 = arith.constant 0 : index
    %4 = vector.load %arg3[%c0_2, %c0_3] : memref<32x128xf32, #tpu.memory_space<vmem>>, vector<32x128xf32>
    %c0_4 = arith.constant 0 : index
    %c0_5 = arith.constant 0 : index
    %5 = vector.load %arg4[%c0_4, %c0_5] : memref<1x128xf32, #tpu.memory_space<vmem>>, vector<1x128xf32>
    %c0_6 = arith.constant 0 : index
    %c0_7 = arith.constant 0 : index
    %6 = vector.load %arg10[%c0_6, %c0_7] : memref<2x32xf32, #tpu.memory_space<vmem>>, vector<2x32xf32>
    %c0_8 = arith.constant 0 : index
    %c0_9 = arith.constant 0 : index
    %7 = vector.load %arg11[%c0_8, %c0_9] : memref<2x32xf32, #tpu.memory_space<vmem>>, vector<2x32xf32>
    %c0_10 = arith.constant 0 : index
    %c0_11 = arith.constant 0 : index
    %c0_12 = arith.constant 0 : index
    %8 = vector.load %arg1[%c0_10, %c0_11, %c0_12] : memref<8x2x16xf32, #tpu.memory_space<vmem>>, vector<1x2x16xf32>
    %9 = vector.shape_cast %8 : vector<1x2x16xf32> to vector<2x16xf32>
    %cst = arith.constant dense<0.000000e+00> : vector<2x128xf32>
    %10 = tpu.matmul %9, %3, %cst {dimension_numbers = #tpu.dot_dimension_numbers<[1], [0], [0], [1], [0, 0, 1, 1], [], []>} : vector<2x16xf32>, vector<16x128xf32>, vector<2x128xf32> -> vector<2x128xf32>
    %cst_13 = arith.constant dense<0.000000e+00> : vector<2x128xf32>
    %11 = tpu.matmul %6, %4, %cst_13 {dimension_numbers = #tpu.dot_dimension_numbers<[1], [0], [0], [1], [0, 0, 1, 1], [], []>} : vector<2x32xf32>, vector<32x128xf32>, vector<2x128xf32> -> vector<2x128xf32>
    %12 = arith.addf %10, %11 : vector<2x128xf32>
    %13 = vector.broadcast %5 : vector<1x128xf32> to vector<2x128xf32>
    %14 = arith.addf %12, %13 : vector<2x128xf32>
    %15 = vector.extract_strided_slice %14 {offsets = [0, 0], sizes = [2, 32], strides = [1, 1]} : vector<2x128xf32> to vector<2x32xf32>
    %16 = arith.negf %15 : vector<2x32xf32>
    %17 = math.exp %16 : vector<2x32xf32>
    %cst_14 = arith.constant 1.000000e+00 : f32
    %18 = vector.broadcast %cst_14 : f32 to vector<2x32xf32>
    %19 = arith.addf %18, %17 : vector<2x32xf32>
    %20 = arith.divf %18, %19 : vector<2x32xf32>
    %21 = vector.extract_strided_slice %14 {offsets = [0, 32], sizes = [2, 32], strides = [1, 1]} : vector<2x128xf32> to vector<2x32xf32>
    %22 = arith.negf %21 : vector<2x32xf32>
    %23 = math.exp %22 : vector<2x32xf32>
    %cst_15 = arith.constant 1.000000e+00 : f32
    %24 = vector.broadcast %cst_15 : f32 to vector<2x32xf32>
    %25 = arith.addf %24, %23 : vector<2x32xf32>
    %26 = arith.divf %24, %25 : vector<2x32xf32>
    %27 = vector.extract_strided_slice %14 {offsets = [0, 64], sizes = [2, 32], strides = [1, 1]} : vector<2x128xf32> to vector<2x32xf32>
    %28 = math.tanh %27 : vector<2x32xf32>
    %29 = vector.extract_strided_slice %14 {offsets = [0, 96], sizes = [2, 32], strides = [1, 1]} : vector<2x128xf32> to vector<2x32xf32>
    %30 = arith.negf %29 : vector<2x32xf32>
    %31 = math.exp %30 : vector<2x32xf32>
    %cst_16 = arith.constant 1.000000e+00 : f32
    %32 = vector.broadcast %cst_16 : f32 to vector<2x32xf32>
    %33 = arith.addf %32, %31 : vector<2x32xf32>
    %34 = arith.divf %32, %33 : vector<2x32xf32>
    %35 = arith.mulf %26, %7 : vector<2x32xf32>
    %36 = arith.mulf %20, %28 : vector<2x32xf32>
    %37 = arith.addf %35, %36 : vector<2x32xf32>
    %38 = math.tanh %37 : vector<2x32xf32>
    %39 = arith.mulf %34, %38 : vector<2x32xf32>
    %40 = vector.shape_cast %39 : vector<2x32xf32> to vector<2x1x32xf32>
    %c0_17 = arith.constant 0 : index
    %c0_18 = arith.constant 0 : index
    %c0_19 = arith.constant 0 : index
    %41 = vector.load %arg7[%c0_17, %c0_18, %c0_19] : memref<2x8x32xf32, #tpu.memory_space<vmem>>, vector<2x1x32xf32>
    tpu.vector_store %arg7[%c0_17, %c0_18, %c0_19], %40 {strides = array<i32>} : memref<2x8x32xf32, #tpu.memory_space<vmem>>, vector<2x1x32xf32>,
    %c1 = arith.constant 1 : index
    %c0_20 = arith.constant 0 : index
    %c0_21 = arith.constant 0 : index
    %42 = vector.load %arg1[%c1, %c0_20, %c0_21] : memref<8x2x16xf32, #tpu.memory_space<vmem>>, vector<1x2x16xf32>
    %43 = vector.shape_cast %42 : vector<1x2x16xf32> to vector<2x16xf32>
    %cst_22 = arith.constant dense<0.000000e+00> : vector<2x128xf32>
    %44 = tpu.matmul %43, %3, %cst_22 {dimension_numbers = #tpu.dot_dimension_numbers<[1], [0], [0], [1], [0, 0, 1, 1], [], []>} : vector<2x16xf32>, vector<16x128xf32>, vector<2x128xf32> -> vector<2x128xf32>
    %cst_23 = arith.constant dense<0.000000e+00> : vector<2x128xf32>
    %45 = tpu.matmul %39, %4, %cst_23 {dimension_numbers = #tpu.dot_dimension_numbers<[1], [0], [0], [1], [0, 0, 1, 1], [], []>} : vector<2x32xf32>, vector<32x128xf32>, vector<2x128xf32> -> vector<2x128xf32>
    %46 = arith.addf %44, %45 : vector<2x128xf32>
    %47 = vector.broadcast %5 : vector<1x128xf32> to vector<2x128xf32>
    %48 = arith.addf %46, %47 : vector<2x128xf32>
    %49 = vector.extract_strided_slice %48 {offsets = [0, 0], sizes = [2, 32], strides = [1, 1]} : vector<2x128xf32> to vector<2x32xf32>
    %50 = arith.negf %49 : vector<2x32xf32>
    %51 = math.exp %50 : vector<2x32xf32>
    %cst_24 = arith.constant 1.000000e+00 : f32
    %52 = vector.broadcast %cst_24 : f32 to vector<2x32xf32>
    %53 = arith.addf %52, %51 : vector<2x32xf32>
    %54 = arith.divf %52, %53 : vector<2x32xf32>
    %55 = vector.extract_strided_slice %48 {offsets = [0, 32], sizes = [2, 32], strides = [1, 1]} : vector<2x128xf32> to vector<2x32xf32>
    %56 = arith.negf %55 : vector<2x32xf32>
    %57 = math.exp %56 : vector<2x32xf32>
    %cst_25 = arith.constant 1.000000e+00 : f32
    %58 = vector.broadcast %cst_25 : f32 to vector<2x32xf32>
    %59 = arith.addf %58, %57 : vector<2x32xf32>
    %60 = arith.divf %58, %59 : vector<2x32xf32>
    %61 = vector.extract_strided_slice %48 {offsets = [0, 64], sizes = [2, 32], strides = [1, 1]} : vector<2x128xf32> to vector<2x32xf32>
    %62 = math.tanh %61 : vector<2x32xf32>
    %63 = vector.extract_strided_slice %48 {offsets = [0, 96], sizes = [2, 32], strides = [1, 1]} : vector<2x128xf32> to vector<2x32xf32>
    %64 = arith.negf %63 : vector<2x32xf32>
    %65 = math.exp %64 : vector<2x32xf32>
    %cst_26 = arith.constant 1.000000e+00 : f32
    %66 = vector.broadcast %cst_26 : f32 to vector<2x32xf32>
    %67 = arith.addf %66, %65 : vector<2x32xf32>
    %68 = arith.divf %66, %67 : vector<2x32xf32>
    %69 = arith.mulf %60, %37 : vector<2x32xf32>
    %70 = arith.mulf %54, %62 : vector<2x32xf32>
    %71 = arith.addf %69, %70 : vector<2x32xf32>
    %72 = math.tanh %71 : vector<2x32xf32>
    %73 = arith.mulf %68, %72 : vector<2x32xf32>
    %74 = vector.shape_cast %73 : vector<2x32xf32> to vector<2x1x32xf32>
    %c0_27 = arith.constant 0 : index
    %c1_28 = arith.constant 1 : index
    %c0_29 = arith.constant 0 : index
    %75 = vector.load %arg7[%c0_27, %c1_28, %c0_29] : memref<2x8x32xf32, #tpu.memory_space<vmem>>, vector<2x1x32xf32>
    tpu.vector_store %arg7[%c0_27, %c1_28, %c0_29], %74 {strides = array<i32>} : memref<2x8x32xf32, #tpu.memory_space<vmem>>, vector<2x1x32xf32>,
    %c2 = arith.constant 2 : index
    %c0_30 = arith.constant 0 : index
    %c0_31 = arith.constant 0 : index
    %76 = vector.load %arg1[%c2, %c0_30, %c0_31] : memref<8x2x16xf32, #tpu.memory_space<vmem>>, vector<1x2x16xf32>
    %77 = vector.shape_cast %76 : vector<1x2x16xf32> to vector<2x16xf32>
    %cst_32 = arith.constant dense<0.000000e+00> : vector<2x128xf32>
    %78 = tpu.matmul %77, %3, %cst_32 {dimension_numbers = #tpu.dot_dimension_numbers<[1], [0], [0], [1], [0, 0, 1, 1], [], []>} : vector<2x16xf32>, vector<16x128xf32>, vector<2x128xf32> -> vector<2x128xf32>
    %cst_33 = arith.constant dense<0.000000e+00> : vector<2x128xf32>
    %79 = tpu.matmul %73, %4, %cst_33 {dimension_numbers = #tpu.dot_dimension_numbers<[1], [0], [0], [1], [0, 0, 1, 1], [], []>} : vector<2x32xf32>, vector<32x128xf32>, vector<2x128xf32> -> vector<2x128xf32>
    %80 = arith.addf %78, %79 : vector<2x128xf32>
    %81 = vector.broadcast %5 : vector<1x128xf32> to vector<2x128xf32>
    %82 = arith.addf %80, %81 : vector<2x128xf32>
    %83 = vector.extract_strided_slice %82 {offsets = [0, 0], sizes = [2, 32], strides = [1, 1]} : vector<2x128xf32> to vector<2x32xf32>
    %84 = arith.negf %83 : vector<2x32xf32>
    %85 = math.exp %84 : vector<2x32xf32>
    %cst_34 = arith.constant 1.000000e+00 : f32
    %86 = vector.broadcast %cst_34 : f32 to vector<2x32xf32>
    %87 = arith.addf %86, %85 : vector<2x32xf32>
    %88 = arith.divf %86, %87 : vector<2x32xf32>
    %89 = vector.extract_strided_slice %82 {offsets = [0, 32], sizes = [2, 32], strides = [1, 1]} : vector<2x128xf32> to vector<2x32xf32>
    %90 = arith.negf %89 : vector<2x32xf32>
    %91 = math.exp %90 : vector<2x32xf32>
    %cst_35 = arith.constant 1.000000e+00 : f32
    %92 = vector.broadcast %cst_35 : f32 to vector<2x32xf32>
    %93 = arith.addf %92, %91 : vector<2x32xf32>
    %94 = arith.divf %92, %93 : vector<2x32xf32>
    %95 = vector.extract_strided_slice %82 {offsets = [0, 64], sizes = [2, 32], strides = [1, 1]} : vector<2x128xf32> to vector<2x32xf32>
    %96 = math.tanh %95 : vector<2x32xf32>
    %97 = vector.extract_strided_slice %82 {offsets = [0, 96], sizes = [2, 32], strides = [1, 1]} : vector<2x128xf32> to vector<2x32xf32>
    %98 = arith.negf %97 : vector<2x32xf32>
    %99 = math.exp %98 : vector<2x32xf32>
    %cst_36 = arith.constant 1.000000e+00 : f32
    %100 = vector.broadcast %cst_36 : f32 to vector<2x32xf32>
    %101 = arith.addf %100, %99 : vector<2x32xf32>
    %102 = arith.divf %100, %101 : vector<2x32xf32>
    %103 = arith.mulf %94, %71 : vector<2x32xf32>
    %104 = arith.mulf %88, %96 : vector<2x32xf32>
    %105 = arith.addf %103, %104 : vector<2x32xf32>
    %106 = math.tanh %105 : vector<2x32xf32>
    %107 = arith.mulf %102, %106 : vector<2x32xf32>
    %108 = vector.shape_cast %107 : vector<2x32xf32> to vector<2x1x32xf32>
    %c0_37 = arith.constant 0 : index
    %c2_38 = arith.constant 2 : index
    %c0_39 = arith.constant 0 : index
    %109 = vector.load %arg7[%c0_37, %c2_38, %c0_39] : memref<2x8x32xf32, #tpu.memory_space<vmem>>, vector<2x1x32xf32>
    tpu.vector_store %arg7[%c0_37, %c2_38, %c0_39], %108 {strides = array<i32>} : memref<2x8x32xf32, #tpu.memory_space<vmem>>, vector<2x1x32xf32>,
    %c3 = arith.constant 3 : index
    %c0_40 = arith.constant 0 : index
    %c0_41 = arith.constant 0 : index
    %110 = vector.load %arg1[%c3, %c0_40, %c0_41] : memref<8x2x16xf32, #tpu.memory_space<vmem>>, vector<1x2x16xf32>
    %111 = vector.shape_cast %110 : vector<1x2x16xf32> to vector<2x16xf32>
    %cst_42 = arith.constant dense<0.000000e+00> : vector<2x128xf32>
    %112 = tpu.matmul %111, %3, %cst_42 {dimension_numbers = #tpu.dot_dimension_numbers<[1], [0], [0], [1], [0, 0, 1, 1], [], []>} : vector<2x16xf32>, vector<16x128xf32>, vector<2x128xf32> -> vector<2x128xf32>
    %cst_43 = arith.constant dense<0.000000e+00> : vector<2x128xf32>
    %113 = tpu.matmul %107, %4, %cst_43 {dimension_numbers = #tpu.dot_dimension_numbers<[1], [0], [0], [1], [0, 0, 1, 1], [], []>} : vector<2x32xf32>, vector<32x128xf32>, vector<2x128xf32> -> vector<2x128xf32>
    %114 = arith.addf %112, %113 : vector<2x128xf32>
    %115 = vector.broadcast %5 : vector<1x128xf32> to vector<2x128xf32>
    %116 = arith.addf %114, %115 : vector<2x128xf32>
    %117 = vector.extract_strided_slice %116 {offsets = [0, 0], sizes = [2, 32], strides = [1, 1]} : vector<2x128xf32> to vector<2x32xf32>
    %118 = arith.negf %117 : vector<2x32xf32>
    %119 = math.exp %118 : vector<2x32xf32>
    %cst_44 = arith.constant 1.000000e+00 : f32
    %120 = vector.broadcast %cst_44 : f32 to vector<2x32xf32>
    %121 = arith.addf %120, %119 : vector<2x32xf32>
    %122 = arith.divf %120, %121 : vector<2x32xf32>
    %123 = vector.extract_strided_slice %116 {offsets = [0, 32], sizes = [2, 32], strides = [1, 1]} : vector<2x128xf32> to vector<2x32xf32>
    %124 = arith.negf %123 : vector<2x32xf32>
    %125 = math.exp %124 : vector<2x32xf32>
    %cst_45 = arith.constant 1.000000e+00 : f32
    %126 = vector.broadcast %cst_45 : f32 to vector<2x32xf32>
    %127 = arith.addf %126, %125 : vector<2x32xf32>
    %128 = arith.divf %126, %127 : vector<2x32xf32>
    %129 = vector.extract_strided_slice %116 {offsets = [0, 64], sizes = [2, 32], strides = [1, 1]} : vector<2x128xf32> to vector<2x32xf32>
    %130 = math.tanh %129 : vector<2x32xf32>
    %131 = vector.extract_strided_slice %116 {offsets = [0, 96], sizes = [2, 32], strides = [1, 1]} : vector<2x128xf32> to vector<2x32xf32>
    %132 = arith.negf %131 : vector<2x32xf32>
    %133 = math.exp %132 : vector<2x32xf32>
    %cst_46 = arith.constant 1.000000e+00 : f32
    %134 = vector.broadcast %cst_46 : f32 to vector<2x32xf32>
    %135 = arith.addf %134, %133 : vector<2x32xf32>
    %136 = arith.divf %134, %135 : vector<2x32xf32>
    %137 = arith.mulf %128, %105 : vector<2x32xf32>
    %138 = arith.mulf %122, %130 : vector<2x32xf32>
    %139 = arith.addf %137, %138 : vector<2x32xf32>
    %140 = math.tanh %139 : vector<2x32xf32>
    %141 = arith.mulf %136, %140 : vector<2x32xf32>
    %142 = vector.shape_cast %141 : vector<2x32xf32> to vector<2x1x32xf32>
    %c0_47 = arith.constant 0 : index
    %c3_48 = arith.constant 3 : index
    %c0_49 = arith.constant 0 : index
    %143 = vector.load %arg7[%c0_47, %c3_48, %c0_49] : memref<2x8x32xf32, #tpu.memory_space<vmem>>, vector<2x1x32xf32>
    tpu.vector_store %arg7[%c0_47, %c3_48, %c0_49], %142 {strides = array<i32>} : memref<2x8x32xf32, #tpu.memory_space<vmem>>, vector<2x1x32xf32>,
    %c4 = arith.constant 4 : index
    %c0_50 = arith.constant 0 : index
    %c0_51 = arith.constant 0 : index
    %144 = vector.load %arg1[%c4, %c0_50, %c0_51] : memref<8x2x16xf32, #tpu.memory_space<vmem>>, vector<1x2x16xf32>
    %145 = vector.shape_cast %144 : vector<1x2x16xf32> to vector<2x16xf32>
    %cst_52 = arith.constant dense<0.000000e+00> : vector<2x128xf32>
    %146 = tpu.matmul %145, %3, %cst_52 {dimension_numbers = #tpu.dot_dimension_numbers<[1], [0], [0], [1], [0, 0, 1, 1], [], []>} : vector<2x16xf32>, vector<16x128xf32>, vector<2x128xf32> -> vector<2x128xf32>
    %cst_53 = arith.constant dense<0.000000e+00> : vector<2x128xf32>
    %147 = tpu.matmul %141, %4, %cst_53 {dimension_numbers = #tpu.dot_dimension_numbers<[1], [0], [0], [1], [0, 0, 1, 1], [], []>} : vector<2x32xf32>, vector<32x128xf32>, vector<2x128xf32> -> vector<2x128xf32>
    %148 = arith.addf %146, %147 : vector<2x128xf32>
    %149 = vector.broadcast %5 : vector<1x128xf32> to vector<2x128xf32>
    %150 = arith.addf %148, %149 : vector<2x128xf32>
    %151 = vector.extract_strided_slice %150 {offsets = [0, 0], sizes = [2, 32], strides = [1, 1]} : vector<2x128xf32> to vector<2x32xf32>
    %152 = arith.negf %151 : vector<2x32xf32>
    %153 = math.exp %152 : vector<2x32xf32>
    %cst_54 = arith.constant 1.000000e+00 : f32
    %154 = vector.broadcast %cst_54 : f32 to vector<2x32xf32>
    %155 = arith.addf %154, %153 : vector<2x32xf32>
    %156 = arith.divf %154, %155 : vector<2x32xf32>
    %157 = vector.extract_strided_slice %150 {offsets = [0, 32], sizes = [2, 32], strides = [1, 1]} : vector<2x128xf32> to vector<2x32xf32>
    %158 = arith.negf %157 : vector<2x32xf32>
    %159 = math.exp %158 : vector<2x32xf32>
    %cst_55 = arith.constant 1.000000e+00 : f32
    %160 = vector.broadcast %cst_55 : f32 to vector<2x32xf32>
    %161 = arith.addf %160, %159 : vector<2x32xf32>
    %162 = arith.divf %160, %161 : vector<2x32xf32>
    %163 = vector.extract_strided_slice %150 {offsets = [0, 64], sizes = [2, 32], strides = [1, 1]} : vector<2x128xf32> to vector<2x32xf32>
    %164 = math.tanh %163 : vector<2x32xf32>
    %165 = vector.extract_strided_slice %150 {offsets = [0, 96], sizes = [2, 32], strides = [1, 1]} : vector<2x128xf32> to vector<2x32xf32>
    %166 = arith.negf %165 : vector<2x32xf32>
    %167 = math.exp %166 : vector<2x32xf32>
    %cst_56 = arith.constant 1.000000e+00 : f32
    %168 = vector.broadcast %cst_56 : f32 to vector<2x32xf32>
    %169 = arith.addf %168, %167 : vector<2x32xf32>
    %170 = arith.divf %168, %169 : vector<2x32xf32>
    %171 = arith.mulf %162, %139 : vector<2x32xf32>
    %172 = arith.mulf %156, %164 : vector<2x32xf32>
    %173 = arith.addf %171, %172 : vector<2x32xf32>
    %174 = math.tanh %173 : vector<2x32xf32>
    %175 = arith.mulf %170, %174 : vector<2x32xf32>
    %176 = vector.shape_cast %175 : vector<2x32xf32> to vector<2x1x32xf32>
    %c0_57 = arith.constant 0 : index
    %c4_58 = arith.constant 4 : index
    %c0_59 = arith.constant 0 : index
    %177 = vector.load %arg7[%c0_57, %c4_58, %c0_59] : memref<2x8x32xf32, #tpu.memory_space<vmem>>, vector<2x1x32xf32>
    tpu.vector_store %arg7[%c0_57, %c4_58, %c0_59], %176 {strides = array<i32>} : memref<2x8x32xf32, #tpu.memory_space<vmem>>, vector<2x1x32xf32>,
    %c5 = arith.constant 5 : index
    %c0_60 = arith.constant 0 : index
    %c0_61 = arith.constant 0 : index
    %178 = vector.load %arg1[%c5, %c0_60, %c0_61] : memref<8x2x16xf32, #tpu.memory_space<vmem>>, vector<1x2x16xf32>
    %179 = vector.shape_cast %178 : vector<1x2x16xf32> to vector<2x16xf32>
    %cst_62 = arith.constant dense<0.000000e+00> : vector<2x128xf32>
    %180 = tpu.matmul %179, %3, %cst_62 {dimension_numbers = #tpu.dot_dimension_numbers<[1], [0], [0], [1], [0, 0, 1, 1], [], []>} : vector<2x16xf32>, vector<16x128xf32>, vector<2x128xf32> -> vector<2x128xf32>
    %cst_63 = arith.constant dense<0.000000e+00> : vector<2x128xf32>
    %181 = tpu.matmul %175, %4, %cst_63 {dimension_numbers = #tpu.dot_dimension_numbers<[1], [0], [0], [1], [0, 0, 1, 1], [], []>} : vector<2x32xf32>, vector<32x128xf32>, vector<2x128xf32> -> vector<2x128xf32>
    %182 = arith.addf %180, %181 : vector<2x128xf32>
    %183 = vector.broadcast %5 : vector<1x128xf32> to vector<2x128xf32>
    %184 = arith.addf %182, %183 : vector<2x128xf32>
    %185 = vector.extract_strided_slice %184 {offsets = [0, 0], sizes = [2, 32], strides = [1, 1]} : vector<2x128xf32> to vector<2x32xf32>
    %186 = arith.negf %185 : vector<2x32xf32>
    %187 = math.exp %186 : vector<2x32xf32>
    %cst_64 = arith.constant 1.000000e+00 : f32
    %188 = vector.broadcast %cst_64 : f32 to vector<2x32xf32>
    %189 = arith.addf %188, %187 : vector<2x32xf32>
    %190 = arith.divf %188, %189 : vector<2x32xf32>
    %191 = vector.extract_strided_slice %184 {offsets = [0, 32], sizes = [2, 32], strides = [1, 1]} : vector<2x128xf32> to vector<2x32xf32>
    %192 = arith.negf %191 : vector<2x32xf32>
    %193 = math.exp %192 : vector<2x32xf32>
    %cst_65 = arith.constant 1.000000e+00 : f32
    %194 = vector.broadcast %cst_65 : f32 to vector<2x32xf32>
    %195 = arith.addf %194, %193 : vector<2x32xf32>
    %196 = arith.divf %194, %195 : vector<2x32xf32>
    %197 = vector.extract_strided_slice %184 {offsets = [0, 64], sizes = [2, 32], strides = [1, 1]} : vector<2x128xf32> to vector<2x32xf32>
    %198 = math.tanh %197 : vector<2x32xf32>
    %199 = vector.extract_strided_slice %184 {offsets = [0, 96], sizes = [2, 32], strides = [1, 1]} : vector<2x128xf32> to vector<2x32xf32>
    %200 = arith.negf %199 : vector<2x32xf32>
    %201 = math.exp %200 : vector<2x32xf32>
    %cst_66 = arith.constant 1.000000e+00 : f32
    %202 = vector.broadcast %cst_66 : f32 to vector<2x32xf32>
    %203 = arith.addf %202, %201 : vector<2x32xf32>
    %204 = arith.divf %202, %203 : vector<2x32xf32>
    %205 = arith.mulf %196, %173 : vector<2x32xf32>
    %206 = arith.mulf %190, %198 : vector<2x32xf32>
    %207 = arith.addf %205, %206 : vector<2x32xf32>
    %208 = math.tanh %207 : vector<2x32xf32>
    %209 = arith.mulf %204, %208 : vector<2x32xf32>
    %210 = vector.shape_cast %209 : vector<2x32xf32> to vector<2x1x32xf32>
    %c0_67 = arith.constant 0 : index
    %c5_68 = arith.constant 5 : index
    %c0_69 = arith.constant 0 : index
    %211 = vector.load %arg7[%c0_67, %c5_68, %c0_69] : memref<2x8x32xf32, #tpu.memory_space<vmem>>, vector<2x1x32xf32>
    tpu.vector_store %arg7[%c0_67, %c5_68, %c0_69], %210 {strides = array<i32>} : memref<2x8x32xf32, #tpu.memory_space<vmem>>, vector<2x1x32xf32>,
    %c6 = arith.constant 6 : index
    %c0_70 = arith.constant 0 : index
    %c0_71 = arith.constant 0 : index
    %212 = vector.load %arg1[%c6, %c0_70, %c0_71] : memref<8x2x16xf32, #tpu.memory_space<vmem>>, vector<1x2x16xf32>
    %213 = vector.shape_cast %212 : vector<1x2x16xf32> to vector<2x16xf32>
    %cst_72 = arith.constant dense<0.000000e+00> : vector<2x128xf32>
    %214 = tpu.matmul %213, %3, %cst_72 {dimension_numbers = #tpu.dot_dimension_numbers<[1], [0], [0], [1], [0, 0, 1, 1], [], []>} : vector<2x16xf32>, vector<16x128xf32>, vector<2x128xf32> -> vector<2x128xf32>
    %cst_73 = arith.constant dense<0.000000e+00> : vector<2x128xf32>
    %215 = tpu.matmul %209, %4, %cst_73 {dimension_numbers = #tpu.dot_dimension_numbers<[1], [0], [0], [1], [0, 0, 1, 1], [], []>} : vector<2x32xf32>, vector<32x128xf32>, vector<2x128xf32> -> vector<2x128xf32>
    %216 = arith.addf %214, %215 : vector<2x128xf32>
    %217 = vector.broadcast %5 : vector<1x128xf32> to vector<2x128xf32>
    %218 = arith.addf %216, %217 : vector<2x128xf32>
    %219 = vector.extract_strided_slice %218 {offsets = [0, 0], sizes = [2, 32], strides = [1, 1]} : vector<2x128xf32> to vector<2x32xf32>
    %220 = arith.negf %219 : vector<2x32xf32>
    %221 = math.exp %220 : vector<2x32xf32>
    %cst_74 = arith.constant 1.000000e+00 : f32
    %222 = vector.broadcast %cst_74 : f32 to vector<2x32xf32>
    %223 = arith.addf %222, %221 : vector<2x32xf32>
    %224 = arith.divf %222, %223 : vector<2x32xf32>
    %225 = vector.extract_strided_slice %218 {offsets = [0, 32], sizes = [2, 32], strides = [1, 1]} : vector<2x128xf32> to vector<2x32xf32>
    %226 = arith.negf %225 : vector<2x32xf32>
    %227 = math.exp %226 : vector<2x32xf32>
    %cst_75 = arith.constant 1.000000e+00 : f32
    %228 = vector.broadcast %cst_75 : f32 to vector<2x32xf32>
    %229 = arith.addf %228, %227 : vector<2x32xf32>
    %230 = arith.divf %228, %229 : vector<2x32xf32>
    %231 = vector.extract_strided_slice %218 {offsets = [0, 64], sizes = [2, 32], strides = [1, 1]} : vector<2x128xf32> to vector<2x32xf32>
    %232 = math.tanh %231 : vector<2x32xf32>
    %233 = vector.extract_strided_slice %218 {offsets = [0, 96], sizes = [2, 32], strides = [1, 1]} : vector<2x128xf32> to vector<2x32xf32>
    %234 = arith.negf %233 : vector<2x32xf32>
    %235 = math.exp %234 : vector<2x32xf32>
    %cst_76 = arith.constant 1.000000e+00 : f32
    %236 = vector.broadcast %cst_76 : f32 to vector<2x32xf32>
    %237 = arith.addf %236, %235 : vector<2x32xf32>
    %238 = arith.divf %236, %237 : vector<2x32xf32>
    %239 = arith.mulf %230, %207 : vector<2x32xf32>
    %240 = arith.mulf %224, %232 : vector<2x32xf32>
    %241 = arith.addf %239, %240 : vector<2x32xf32>
    %242 = math.tanh %241 : vector<2x32xf32>
    %243 = arith.mulf %238, %242 : vector<2x32xf32>
    %244 = vector.shape_cast %243 : vector<2x32xf32> to vector<2x1x32xf32>
    %c0_77 = arith.constant 0 : index
    %c6_78 = arith.constant 6 : index
    %c0_79 = arith.constant 0 : index
    %245 = vector.load %arg7[%c0_77, %c6_78, %c0_79] : memref<2x8x32xf32, #tpu.memory_space<vmem>>, vector<2x1x32xf32>
    tpu.vector_store %arg7[%c0_77, %c6_78, %c0_79], %244 {strides = array<i32>} : memref<2x8x32xf32, #tpu.memory_space<vmem>>, vector<2x1x32xf32>,
    %c7 = arith.constant 7 : index
    %c0_80 = arith.constant 0 : index
    %c0_81 = arith.constant 0 : index
    %246 = vector.load %arg1[%c7, %c0_80, %c0_81] : memref<8x2x16xf32, #tpu.memory_space<vmem>>, vector<1x2x16xf32>
    %247 = vector.shape_cast %246 : vector<1x2x16xf32> to vector<2x16xf32>
    %cst_82 = arith.constant dense<0.000000e+00> : vector<2x128xf32>
    %248 = tpu.matmul %247, %3, %cst_82 {dimension_numbers = #tpu.dot_dimension_numbers<[1], [0], [0], [1], [0, 0, 1, 1], [], []>} : vector<2x16xf32>, vector<16x128xf32>, vector<2x128xf32> -> vector<2x128xf32>
    %cst_83 = arith.constant dense<0.000000e+00> : vector<2x128xf32>
    %249 = tpu.matmul %243, %4, %cst_83 {dimension_numbers = #tpu.dot_dimension_numbers<[1], [0], [0], [1], [0, 0, 1, 1], [], []>} : vector<2x32xf32>, vector<32x128xf32>, vector<2x128xf32> -> vector<2x128xf32>
    %250 = arith.addf %248, %249 : vector<2x128xf32>
    %251 = vector.broadcast %5 : vector<1x128xf32> to vector<2x128xf32>
    %252 = arith.addf %250, %251 : vector<2x128xf32>
    %253 = vector.extract_strided_slice %252 {offsets = [0, 0], sizes = [2, 32], strides = [1, 1]} : vector<2x128xf32> to vector<2x32xf32>
    %254 = arith.negf %253 : vector<2x32xf32>
    %255 = math.exp %254 : vector<2x32xf32>
    %cst_84 = arith.constant 1.000000e+00 : f32
    %256 = vector.broadcast %cst_84 : f32 to vector<2x32xf32>
    %257 = arith.addf %256, %255 : vector<2x32xf32>
    %258 = arith.divf %256, %257 : vector<2x32xf32>
    %259 = vector.extract_strided_slice %252 {offsets = [0, 32], sizes = [2, 32], strides = [1, 1]} : vector<2x128xf32> to vector<2x32xf32>
    %260 = arith.negf %259 : vector<2x32xf32>
    %261 = math.exp %260 : vector<2x32xf32>
    %cst_85 = arith.constant 1.000000e+00 : f32
    %262 = vector.broadcast %cst_85 : f32 to vector<2x32xf32>
    %263 = arith.addf %262, %261 : vector<2x32xf32>
    %264 = arith.divf %262, %263 : vector<2x32xf32>
    %265 = vector.extract_strided_slice %252 {offsets = [0, 64], sizes = [2, 32], strides = [1, 1]} : vector<2x128xf32> to vector<2x32xf32>
    %266 = math.tanh %265 : vector<2x32xf32>
    %267 = vector.extract_strided_slice %252 {offsets = [0, 96], sizes = [2, 32], strides = [1, 1]} : vector<2x128xf32> to vector<2x32xf32>
    %268 = arith.negf %267 : vector<2x32xf32>
    %269 = math.exp %268 : vector<2x32xf32>
    %cst_86 = arith.constant 1.000000e+00 : f32
    %270 = vector.broadcast %cst_86 : f32 to vector<2x32xf32>
    %271 = arith.addf %270, %269 : vector<2x32xf32>
    %272 = arith.divf %270, %271 : vector<2x32xf32>
    %273 = arith.mulf %264, %241 : vector<2x32xf32>
    %274 = arith.mulf %258, %266 : vector<2x32xf32>
    %275 = arith.addf %273, %274 : vector<2x32xf32>
    %276 = math.tanh %275 : vector<2x32xf32>
    %277 = arith.mulf %272, %276 : vector<2x32xf32>
    %278 = vector.shape_cast %277 : vector<2x32xf32> to vector<2x1x32xf32>
    %c0_87 = arith.constant 0 : index
    %c7_88 = arith.constant 7 : index
    %c0_89 = arith.constant 0 : index
    %279 = vector.load %arg7[%c0_87, %c7_88, %c0_89] : memref<2x8x32xf32, #tpu.memory_space<vmem>>, vector<2x1x32xf32>
    tpu.vector_store %arg7[%c0_87, %c7_88, %c0_89], %278 {strides = array<i32>} : memref<2x8x32xf32, #tpu.memory_space<vmem>>, vector<2x1x32xf32>,
    %c0_90 = arith.constant 0 : index
    %c0_91 = arith.constant 0 : index
    %280 = vector.load %arg10[%c0_90, %c0_91] : memref<2x32xf32, #tpu.memory_space<vmem>>, vector<2x32xf32>
    tpu.vector_store %arg10[%c0_90, %c0_91], %277 {strides = array<i32>} : memref<2x32xf32, #tpu.memory_space<vmem>>, vector<2x32xf32>,
    %c0_92 = arith.constant 0 : index
    %c0_93 = arith.constant 0 : index
    %281 = vector.load %arg11[%c0_92, %c0_93] : memref<2x32xf32, #tpu.memory_space<vmem>>, vector<2x32xf32>
    tpu.vector_store %arg11[%c0_92, %c0_93], %275 {strides = array<i32>} : memref<2x32xf32, #tpu.memory_space<vmem>>, vector<2x32xf32>,
    %c0_i32_94 = arith.constant 0 : i32
    %282 = arith.cmpi eq, %arg0, %c0_i32_94 : i32
    %283 = arith.extui %282 : i1 to i32
    %c0_i32_95 = arith.constant 0 : i32
    %284 = arith.cmpi ne, %283, %c0_i32_95 : i32
    scf.if %284 {
      %c0_96 = arith.constant 0 : index
      %c0_97 = arith.constant 0 : index
      %285 = vector.load %arg8[%c0_96, %c0_97] : memref<2x32xf32, #tpu.memory_space<vmem>>, vector<2x32xf32>
      tpu.vector_store %arg8[%c0_96, %c0_97], %277 {strides = array<i32>} : memref<2x32xf32, #tpu.memory_space<vmem>>, vector<2x32xf32>,
      %c0_98 = arith.constant 0 : index
      %c0_99 = arith.constant 0 : index
      %286 = vector.load %arg9[%c0_98, %c0_99] : memref<2x32xf32, #tpu.memory_space<vmem>>, vector<2x32xf32>
      tpu.vector_store %arg9[%c0_98, %c0_99], %275 {strides = array<i32>} : memref<2x32xf32, #tpu.memory_space<vmem>>, vector<2x32xf32>,
    } else {
    }
    return
  }
  func.func @transform_0(%arg0: i32) -> (i32, i32, i32) {
    %c0_i32 = arith.constant 0 : i32
    %c0_i32_0 = arith.constant 0 : i32
    %c0_i32_1 = arith.constant 0 : i32
    return %arg0, %c0_i32, %c0_i32_0 : i32, i32, i32
  }
  func.func @transform_1(%arg0: i32) -> (i32, i32) {
    %c0_i32 = arith.constant 0 : i32
    %c0_i32_0 = arith.constant 0 : i32
    %c0_i32_1 = arith.constant 0 : i32
    return %c0_i32, %c0_i32_0 : i32, i32
  }
  func.func @transform_2(%arg0: i32) -> (i32, i32) {
    %c0_i32 = arith.constant 0 : i32
    %c0_i32_0 = arith.constant 0 : i32
    %c0_i32_1 = arith.constant 0 : i32
    return %c0_i32, %c0_i32_0 : i32, i32
  }
  func.func @transform_3(%arg0: i32) -> (i32, i32) {
    %c0_i32 = arith.constant 0 : i32
    %c0_i32_0 = arith.constant 0 : i32
    %c0_i32_1 = arith.constant 0 : i32
    return %c0_i32, %c0_i32_0 : i32, i32
  }
  func.func @transform_4(%arg0: i32) -> (i32, i32) {
    %c0_i32 = arith.constant 0 : i32
    %c0_i32_0 = arith.constant 0 : i32
    %c0_i32_1 = arith.constant 0 : i32
    return %c0_i32, %c0_i32_0 : i32, i32
  }
  func.func @transform_5(%arg0: i32) -> (i32, i32) {
    %c0_i32 = arith.constant 0 : i32
    %c0_i32_0 = arith.constant 0 : i32
    %c0_i32_1 = arith.constant 0 : i32
    return %c0_i32, %c0_i32_0 : i32, i32
  }
  func.func @transform_6(%arg0: i32) -> (i32, i32, i32) {
    %c0_i32 = arith.constant 0 : i32
    %c0_i32_0 = arith.constant 0 : i32
    %c0_i32_1 = arith.constant 0 : i32
    return %c0_i32, %arg0, %c0_i32_0 : i32, i32, i32
  }
  func.func @transform_7(%arg0: i32) -> (i32, i32) {
    %c0_i32 = arith.constant 0 : i32
    %c0_i32_0 = arith.constant 0 : i32
    %c0_i32_1 = arith.constant 0 : i32
    return %c0_i32, %c0_i32_0 : i32, i32
  }
  func.func @transform_8(%arg0: i32) -> (i32, i32) {
    %c0_i32 = arith.constant 0 : i32
    %c0_i32_0 = arith.constant 0 : i32
    %c0_i32_1 = arith.constant 0 : i32
    return %c0_i32, %c0_i32_0 : i32, i32
  }
}

</mosaic_0001>

<bundles_post_ra>
// kernel: lstm_language_model_forward.3
= control target key start
LH: loop header
LB: loop body
LE: loop exit
PB: predicated region body
PF: predicated region fallthrough
CT: control target
= control target key end

     0   :  { %vm23_vm0 = vcmask 261120   ;;  %s346_s0 = inlined_call_operand.vmem [shape: f32[16,32], index: 0, kind: input, shape index: {}]   ;;  %s347_s1 = inlined_call_operand.vmem [shape: f32[1,32], index: 1, kind: input, shape index: {}]   ;;  %s348_s2 = inlined_call_operand.vmem [shape: f32[1,32], index: 2, kind: input, shape index: {}]   ;;  %s349_s3 = inlined_call_operand.vmem [shape: f32[32,128], index: 3, kind: input, shape index: {}]   ;;  %s350_s4 = inlined_call_operand.vmem [shape: f32[1,128], index: 4, kind: input, shape index: {}]   ;;  %s351_s5 = inlined_call_operand.hbm [shape: f32[16,128], index: 5, kind: output, shape index: {}]  }
   0x1   :  { %v21_v0 = vld [vmem:[%s346_s0] sm:$0xff]  ;;  %v22_v1 = vld [vmem:[%s346_s0 + $0x8] sm:$0xff] }
   0x2   :  { %10 = vsyncpa [#allocation3], 0  ;;  %v24_v2 = vsel %vm23_vm0, %v21_v0, 0.0  ;;  %v27_v3 = vsel %vm23_vm0, %v22_v1, 0.0  ;;  %v69_v14 = vld [vmem:[%s349_s3] sm:$0xff]  ;;  %v70_v15 = vld [vmem:[%s349_s3 + $0x8] sm:$0xff] }
   0x3   :  { %25 = vadd.xlane.f32.xlu0 %v24_v2  ;;  %v71_v16 = vld [vmem:[%s349_s3 + $0x10] sm:$0xff]  ;;  %v221_v17 = vpack.c.bf16 %v70_v15, %v69_v14  ;;  %v72_v18 = vld [vmem:[%s349_s3 + $0x18] sm:$0xff]  ;;  %v199_v27 = vld [vmem:[%s347_s1] ss:$0 sm:$0xff]  ;;  %s268_s1 = smov [#allocation2]  }
   0x4   :  { %v225_v19 = vpack.c.bf16 %v72_v18, %v71_v16  ;;  %v200_v29 = vld [vmem:[%s348_s2] ss:$0 sm:$0xff]  ;;  %s188_s2 = sshll.u32 %s268_s1, 4  ;;  %s189_s2 = int_to_ptr.vmem [resolvable:$true] %s188_s2 }
   0x5   :  { %222 = vmatprep.subr.bf16.mxu0 %v221_v17  ;;  %v201_v36 = vld [vmem:[%s350_s4] ss:$0 sm:$0xff]  ;;  %s244_s4 = scalar_lea.vmem %s189_s2, 256  ;;  %p249_p1 = scmp.lt.s32.totalorder %s189_s2, %s189_s2 }
   0x6   :  { %224 = vmatpush3.bf16.msra.mxu0 %v221_v17  ;;  %p245_p0 = scmp.ne.s32.totalorder %s189_s2, %s244_s4  ;;  %p250_p2 = scmp.lt.s32.totalorder %s244_s4, %s244_s4 }
   0x7   :  { %28 = vadd.xlane.f32.xlu0 %v27_v3  ;;  %226 = vmatprep.subr.bf16.mxu0 %v225_v19 }
   0x8   :  { %p251_p3 = por %p250_p2, %p249_p1 }
   0xa   :  { %228 = vmatpush3.bf16.msra.mxu0 %v225_v19  ;;  %p252_p4 = pnand %p251_p3, %p245_p0 }
  0x90   :  { %v26_v4 = vpop.xlane.xlu0 %25 }
  0x91   :  { %v31_v5 = vmul.f32 0.03125, %v26_v4 }
  0x93   :  { %v33_v6 = vsub.f32 %v21_v0, %v31_v5 }
  0x94   :  { %v29_v7 = vpop.xlane.xlu0 %28 }
  0x95   :  { %v32_v8 = vmul.f32 0.03125, %v29_v7  ;;  %v35_v9 = vmul.f32 %v33_v6, %v33_v6 }
  0x97   :  { %v34_v10 = vsub.f32 %v22_v1, %v32_v8  ;;  %v37_v11 = vsel %vm23_vm0, %v35_v9, 0.0 }
  0x98   :  { %38 = vadd.xlane.f32.xlu1 %v37_v11 }
  0x99   :  { %v36_v12 = vmul.f32 %v34_v10, %v34_v10 }
  0x9b   :  { %v40_v13 = vsel %vm23_vm0, %v36_v12, 0.0 }
  0x9c   :  { %41 = vadd.xlane.f32.xlu1 %v40_v13 }
 0x125   :  { %v39_v20 = vpop.xlane.xlu1 %38 }
 0x126   :  { %v43_v21 = vmul.f32 0.03125, %v39_v20 }
 0x128   :  { %v45_v22 = vadd.f32 1e-05, %v43_v21 }
 0x129   :  { %v42_v23 = vpop.xlane.xlu1 %41 }
 0x12a   :  { %232 = vrsqrt.f32 %v45_v22  ;;  %v44_v24 = vmul.f32 0.03125, %v42_v23 }
 0x12c   :  { %v46_v25 = vadd.f32 1e-05, %v44_v24 }
 0x12e   :  { %234 = vrsqrt.f32 %v46_v25 }
 0x134   :  { %v233_v26 = vpop.eup %232 }
 0x135   :  { %v49_v28 = vmul.f32 %v233_v26, %v33_v6 }
 0x137   :  { %v58_v30 = vmul.f32 %v199_v27, %v49_v28 }
 0x138   :  { %v235_v31 = vpop.eup %234 }
 0x139   :  { %v50_v32 = vmul.f32 %v235_v31, %v34_v10  ;;  %v67_v33 = vadd.f32 %v200_v29, %v58_v30 }
 0x13b   :  { %v59_v34 = vmul.f32 %v199_v27, %v50_v32  ;;  %218 = vmatprep.mubr.msk.f32.mxu0 %vm23_vm0, %v67_v33 }
 0x13d   :  { %v68_v35 = vadd.f32 %v200_v29, %v59_v34 }
 0x13f   :  { %219 = vmatmul.mubr.msk.f32.vlgmr.msra.gmra.mrb[0].mxu0 %vm23_vm0, %v68_v35 }
 0x212   :  { %v220_v37 = vpop.f32.mrb[0].mxu0 }
 0x213   :  { %v158_v38 = vadd.f32 %v220_v37, %v201_v36  ;;  %v152_v39 = vpop.f32.mrb[1].mxu0 }
 0x214   :  { %v153_v40 = vadd.f32 %v201_v36, %v152_v39 }
 0x215   :  { %163 = vmax.xlane.f32.xlu1 %v158_v38 }
 0x216   :  { %161 = vmax.xlane.f32.xlu0 %v153_v40 }
 0x2a2   :  { %v164_v41 = vpop.xlane.xlu1 %163 }
 0x2a3   :  { %v166_v42 = vsub.f32 %v158_v38, %v164_v41  ;;  %v162_v43 = vpop.xlane.xlu0 %161 }
 0x2a4   :  { %v165_v44 = vsub.f32 %v153_v40, %v162_v43 }
 0x2a5   :  { %v169_v45 = vmul.f32 1.442695, %v166_v42 }
 0x2a6   :  { %v167_v46 = vmul.f32 1.442695, %v165_v44 }
 0x2a7   :  { %236 = vpow2.f32 %v169_v45 }
 0x2a8   :  { %238 = vpow2.f32 %v167_v46 }
 0x2b1   :  { %v237_v47 = vpop.eup %236 }
 0x2b2   :  { %v239_v48 = vpop.eup %238  ;;  %173 = vadd.xlane.f32.xlu1 %v237_v47 }
 0x2b3   :  { %171 = vadd.xlane.f32.xlu0 %v239_v48 }
 0x33f   :  { %v174_v49 = vpop.xlane.xlu1 %173 }
 0x340   :  { %240 = vlog2.f32 %v174_v49  ;;  %v172_v50 = vpop.xlane.xlu0 %171 }
 0x341   :  { %242 = vlog2.f32 %v172_v50 }
 0x34a   :  { %v241_v51 = vpop.eup %240 }
 0x34b   :  { %v243_v52 = vpop.eup %242  ;;  %v178_v53 = vmul.f32 0.6931472, %v241_v51 }
 0x34c   :  { %v176_v54 = vmul.f32 0.6931472, %v243_v52 }
 0x34d   :  { %v180_v55 = vsub.f32 %v166_v42, %v178_v53 }
 0x34e   :  { %v179_v56 = vsub.f32 %v165_v44, %v176_v54 }
 0x34f   :  { %182 = vst [vmem:[#allocation2 + $0x8] sm:$0xff] %v180_v55 }
 0x350   :  { %181 = vst [vmem:[#allocation2] sm:$0xff] %v179_v56 }
 0x351   :  { %255 = shalt.err (!%p252_p4)
}
 0x352   :  { %s256_s11 = scalar_lea.hbm %s351_s5, 256 }
 0x353   :  { %p257_p5 = scmp.ne.s32.totalorder %s351_s5, %s256_s11  ;;  %p260_p6 = scmp.lt.u32.totalorder %s256_s11, %s351_s5 }
 0x355   :  { %p262_p7 = pnand %p260_p6, %p257_p5 }
 0x357   :  { %265 = shalt.err (!%p262_p7)
}
 0x358   :  { %s269_s16 = smov 128   ;;  %s270_s17 = smov 8  }
 0x359   :  { %194 = dma.vmem_to_hbm [thread:$0]  %s189_s2, 256, %s351_s5, [#allocation3], %s269_s16, %s269_s16, %s270_s17  }
 0x35a   :  { %266 = dma.done.wait [#allocation3], 256  }
 0x35b   :  { %267 = vsyncadd [#allocation3], 4294967040 }
 0x35c   :  { %198 = vsyncpa [#allocation3], 1 }

// kernel: lstm_language_model_forward.2
= control target key start
LH: loop header
LB: loop body
LE: loop exit
PB: predicated region body
PF: predicated region fallthrough
CT: control target
= control target key end

     0   :  { %14 = vsyncpa [#allocation5], 0  ;;  %v2241_v3 = vmov 0.0|0.0   ;;  %vm33_vm0 = vcmask 254976   ;;  %vm2242_vm1 = vmmov 0   ;;  %v2243_v9 = vmov 0.0   ;;  %s2678_s0 = inlined_call_operand.vmem [shape: f32[8,2,16], index: 0, kind: input, shape index: {}]   ;;  %s2679_s1 = inlined_call_operand.vmem [shape: f32[16,128], index: 1, kind: input, shape index: {}]   ;;  %s2680_s2 = inlined_call_operand.vmem [shape: f32[32,128], index: 2, kind: input, shape index: {}]   ;;  %s2681_s3 = inlined_call_operand.vmem [shape: f32[1,128], index: 3, kind: input, shape index: {}]   ;;  %s2682_s4 = inlined_call_operand.vmem [shape: f32[2,32], index: 4, kind: input, shape index: {}, may-alias: {4,5}]   ;;  %s2683_s5 = inlined_call_operand.vmem [shape: f32[2,32], index: 5, kind: input, shape index: {}, may-alias: {4,5}]   ;;  %s2684_s6 = inlined_call_operand.vmem [shape: f32[2,8,32], index: 6, kind: output, shape index: {0}]   ;;  %s2685_s7 = inlined_call_operand.hbm [shape: f32[2,32], index: 7, kind: output, shape index: {1}]   ;;  %s2686_s8 = inlined_call_operand.hbm [shape: f32[2,32], index: 8, kind: output, shape index: {2}]  }
   0x1   :  { %v39_v0 = vld [vmem:[%s2680_s2] sm:$0xff]  ;;  %v40_v1 = vld [vmem:[%s2680_s2 + $0x8] sm:$0xff]  ;;  %2048 = vmatprep.subr.bf16.mxu0 %v2241_v3  ;;  %2054 = vmatprep.subr.bf16.mxu1 %v2241_v3  ;;  %v41_v6 = vld [vmem:[%s2680_s2 + $0x10] sm:$0xff] }
   0x2   :  { %v37_v2 = vld [vmem:[%s2679_s1] sm:$0xff]  ;;  %v2305_v4 = vpack.c.bf16 %v40_v1, %v39_v0  ;;  %v38_v5 = vld [vmem:[%s2679_s1 + $0x8] sm:$0xff]  ;;  %v42_v7 = vld [vmem:[%s2680_s2 + $0x18] sm:$0xff]  ;;  %1919 = vmatprep.mubr.msk.f32.mxu1 %vm2242_vm1, %v2243_v9  ;;  %1912 = vmatprep.mubr.msk.f32.mxu0 %vm2242_vm1, %v2243_v9 }
   0x3   :  { %v2317_v8 = vpack.c.bf16 %v38_v5, %v37_v2  ;;  %v32_v10 = vld [vmem:[%s2682_s4] sm:$0x3] }
   0x4   :  { %15 = vsyncpa [#allocation7], 0  ;;  %2050 = vmatpush3.bf16.msra.mxu0 %v2305_v4  ;;  %v2327_v11 = vpack.c.bf16 %v42_v7, %v41_v6  ;;  %34 = vst.msk [vmem:[#allocation2] sm:$0x3] %vm33_vm0, %v32_v10  ;;  %v46_v12 = vld [vmem:[%s2678_s0] sm:$0x3] }
   0x5   :  { %2051 = vmatprep.subr.bf16.mxu0 %v2241_v3  ;;  %2056 = vmatpush3.bf16.msra.mxu1 %v2317_v8  ;;  %vm121_vm2 = vcmask 130048   ;;  %vm47_vm3 = vcmask 261120   ;;  %v35_v14 = vld [vmem:[%s2683_s5] sm:$0x3]  ;;  %s2244_s22 = smov 64   ;;  %s2245_s5 = smov 32  }
   0x6   :  { %2057 = vmatprep.subr.bf16.mxu1 %v2241_v3  ;;  %36 = vst.msk [vmem:[#allocation3] sm:$0x3] %vm33_vm0, %v35_v14  ;;  %v2357_v17 = vld [vmem:[%s2681_s3] ss:$0 sm:$0xff]  ;;  %v1812_v34 = vld [vmem:[%s2678_s0 + $0x2] sm:$0x3] }
   0x7   :  { %v1816_v55 = vld [vmem:[%s2678_s0 + $0x4] sm:$0x3]  ;;  %vm267_vm4 = vcmask 253952   ;;  %s2247_s4 = smov 96   ;;  %s2248_s24 = smov [#allocation6]  }
   0x8   :  { %2053 = vmatpush3.bf16.msra.mxu0 %v2327_v11  ;;  %1920 = vmatmul.mubr.msk.f32.vlgmr.msra.gmra.mrb[0].mxu1 %vm121_vm2, %v46_v12  ;;  %s1794_s25 = sshll.u32 %s2248_s24, 4  ;;  %s1795_s25 = int_to_ptr.vmem [resolvable:$true] %s1794_s25 }
   0x9   :  { %2059 = vmatpush3.bf16.msra.mxu1 %v2305_v4  ;;  %2063 = vmatprep.subr.bf16.mxu0 %v2241_v3  ;;  %s2193_s26 = scalar_lea.vmem %s1795_s25, 32  ;;  %p2198_p1 = scmp.lt.s32.totalorder %s1795_s25, %s1795_s25 }
   0xa   :  { %2060 = vmatprep.subr.bf16.mxu1 %v2241_v3  ;;  %1930 = vmatprep.mubr.msk.f32.mxu1 %vm2242_vm1, %v2243_v9  ;;  %p2194_p0 = scmp.ne.s32.totalorder %s1795_s25, %s2193_s26  ;;  %p2199_p2 = scmp.lt.s32.totalorder %s2193_s26, %s2193_s26 }
   0xb   :  { %v44_v13 = vld [vmem:[#allocation2] sm:$0x3] }
   0xc   :  { %1913 = vmatmul.mubr.msk.f32.vlgmr.msra.gmra.mrb[0].mxu0 %vm47_vm3, %v44_v13  ;;  %p2200_p3 = por %p2199_p2, %p2198_p1 }
   0xd   :  { %2065 = vmatpush3.bf16.msra.mxu0 %v2317_v8  ;;  %2062 = vmatpush3.bf16.msra.mxu1 %v2327_v11  ;;  %v45_v23 = vld [vmem:[#allocation3] sm:$0x3] }
   0xe   :  { %1937 = vmatprep.mubr.msk.f32.mxu0 %vm2242_vm1, %v2243_v9  ;;  %2066 = vmatprep.subr.bf16.mxu0 %v2241_v3  ;;  %p2201_p4 = pnand %p2200_p3, %p2194_p0 }
   0xf   :  { %2072 = vmatprep.subr.bf16.mxu1 %v2241_v3 }
  0x10   :  { %1938 = vmatmul.mubr.msk.f32.vlgmr.msra.gmra.mrb[2].mxu0 %vm121_vm2, %v1812_v34 }
  0x11   :  { %2068 = vmatpush3.bf16.msra.mxu0 %v2305_v4  ;;  %1948 = vmatprep.mubr.msk.f32.mxu0 %vm2242_vm1, %v2243_v9 }
  0x12   :  { %2069 = vmatprep.subr.bf16.mxu0 %v2241_v3 }
  0x15   :  { %2071 = vmatpush3.bf16.msra.mxu0 %v2327_v11 }
  0x16   :  { %2081 = vmatprep.subr.bf16.mxu0 %v2241_v3 }
  0xdb   :  { %v191_v15 = vpop.f32.mrb[0].mxu1 }
  0xdc   :  { %v1921_v16 = vpop.f32.mrb[1].mxu1 }
  0xdf   :  { %v117_v18 = vpop.f32.mrb[0].mxu0 }
  0xe0   :  { %v192_v19 = vadd.f32 %v191_v15, %v117_v18  ;;  %v1914_v20 = vpop.f32.mrb[1].mxu0  ;;  %v1820_v18 = vld [vmem:[%s2678_s0 + $0x6] sm:$0x3] }
  0xe2   :  { %v201_v21 = vadd.f32 %v2357_v17, %v192_v19 }
  0xe3   :  { %v415_v38 = vpop.f32.mrb[2].mxu0 }
  0xe4   :  { %2129 = vtanh.f32 %v201_v21  ;;  %v1811_v24 = vmul.f32 -1.442695, %v201_v21  ;;  %v1939_v39 = vpop.f32.mrb[3].mxu0 }
  0xe6   :  { %2131 = vpow2.f32 %v1811_v24 }
  0xee   :  { %v2130_v22 = vpop.eup %2129 }
  0xef   :  { %215 = vrot.lane.b32.xlu0 %v2130_v22, %s2244_s22 }
  0xf0   :  { %v2132_v25 = vpop.eup %2131 }
  0xf1   :  { %v205_v26 = vadd.f32 1.0, %v2132_v25 }
  0xf3   :  { %210 = vrot.lane.b32.xlu0 %v45_v23, %s2245_s5  ;;  %2133 = vrcp.f32 %v205_v26 }
  0xfd   :  { %v2134_v27 = vpop.eup %2133 }
 0x161   :  { %v216_v28 = vpop.permute.xlu0 %215 }
 0x162   :  { %v218_v29 = vmul.f32 %v2134_v27, %v216_v28 }
 0x164   :  { %220 = vrot.lane.b32.xlu1 %v218_v29, %s2245_s5 }
 0x165   :  { %v211_v30 = vpop.permute.xlu0 %210 }
 0x166   :  { %v213_v31 = vmul.f32 %v2134_v27, %v211_v30 }
 0x1d6   :  { %v221_v32 = vpop.permute.xlu1 %220 }
 0x1d7   :  { %v223_v33 = vadd.f32 %v221_v32, %v213_v31 }
 0x1d9   :  { %2135 = vtanh.f32 %v223_v33 }
 0x1e3   :  { %v2136_v35 = vpop.eup %2135 }
 0x1e4   :  { %226 = vrot.lane.b32.xlu1 %v2136_v35, %s2244_s22 }
 0x256   :  { %v227_v36 = vpop.permute.xlu1 %226 }
 0x257   :  { %v2374_v37 = vmul.f32 %v2134_v27, %v227_v36 }
 0x259   :  { %272 = vrot.lane.b32.xlu0 %v2374_v37, %s2245_s5 }
 0x2cb   :  { %v273_v40 = vpop.permute.xlu0 %272 }
 0x2cc   :  { %1931 = vmatmul.mubr.msk.f32.vlgmr.msra.gmra.mrb[2].mxu1 %vm47_vm3, %v273_v40  ;;  %v1824_v40 = vld [vmem:[%s2678_s0 + $0x8] sm:$0x3] }
 0x2cd   :  { %2074 = vmatpush3.bf16.msra.mxu1 %v2317_v8  ;;  %1955 = vmatprep.mubr.msk.f32.mxu1 %vm2242_vm1, %v2243_v9 }
 0x2ce   :  { %2075 = vmatprep.subr.bf16.mxu1 %v2241_v3 }
 0x2d0   :  { %1956 = vmatmul.mubr.msk.f32.vlgmr.msra.gmra.mrb[4].mxu1 %vm121_vm2, %v1816_v55 }
 0x2d1   :  { %2077 = vmatpush3.bf16.msra.mxu1 %v2305_v4  ;;  %1966 = vmatprep.mubr.msk.f32.mxu1 %vm2242_vm1, %v2243_v9 }
 0x2d2   :  { %2078 = vmatprep.subr.bf16.mxu1 %v2241_v3 }
 0x2d5   :  { %2080 = vmatpush3.bf16.msra.mxu1 %v2327_v11 }
 0x2d6   :  { %2090 = vmatprep.subr.bf16.mxu1 %v2241_v3 }
 0x39f   :  { %v342_v41 = vpop.f32.mrb[2].mxu1 }
 0x3a0   :  { %v416_v42 = vadd.f32 %v415_v38, %v342_v41  ;;  %v1932_v43 = vpop.f32.mrb[3].mxu1 }
 0x3a2   :  { %v419_v44 = vadd.f32 %v2357_v17, %v416_v42 }
 0x3a3   :  { %v628_v59 = vpop.f32.mrb[4].mxu1 }
 0x3a4   :  { %2137 = vtanh.f32 %v419_v44  ;;  %v1815_v46 = vmul.f32 -1.442695, %v419_v44  ;;  %v1957_v60 = vpop.f32.mrb[5].mxu1 }
 0x3a6   :  { %2139 = vpow2.f32 %v1815_v46 }
 0x3ae   :  { %v2138_v45 = vpop.eup %2137 }
 0x3af   :  { %429 = vrot.lane.b32.xlu1 %v2138_v45, %s2244_s22 }
 0x3b0   :  { %v2140_v47 = vpop.eup %2139 }
 0x3b1   :  { %v423_v48 = vadd.f32 1.0, %v2140_v47 }
 0x3b3   :  { %2141 = vrcp.f32 %v423_v48 }
 0x3bd   :  { %v2142_v49 = vpop.eup %2141 }
 0x3be   :  { %v427_v52 = vmul.f32 %v2142_v49, %v223_v33 }
 0x421   :  { %v430_v50 = vpop.permute.xlu1 %429 }
 0x422   :  { %v432_v51 = vmul.f32 %v2142_v49, %v430_v50 }
 0x424   :  { %434 = vrot.lane.b32.xlu0 %v432_v51, %s2245_s5 }
 0x496   :  { %v435_v53 = vpop.permute.xlu0 %434 }
 0x497   :  { %v437_v54 = vadd.f32 %v435_v53, %v427_v52 }
 0x499   :  { %2143 = vtanh.f32 %v437_v54 }
 0x4a3   :  { %v2144_v56 = vpop.eup %2143 }
 0x4a4   :  { %440 = vrot.lane.b32.xlu1 %v2144_v56, %s2244_s22 }
 0x516   :  { %v441_v57 = vpop.permute.xlu1 %440 }
 0x517   :  { %v2397_v58 = vmul.f32 %v2142_v49, %v441_v57 }
 0x519   :  { %485 = vrot.lane.b32.xlu0 %v2397_v58, %s2245_s5 }
 0x58b   :  { %v486_v61 = vpop.permute.xlu0 %485 }
 0x58c   :  { %1949 = vmatmul.mubr.msk.f32.vlgmr.msra.gmra.mrb[4].mxu0 %vm47_vm3, %v486_v61 }
 0x58d   :  { %2083 = vmatpush3.bf16.msra.mxu0 %v2317_v8  ;;  %1973 = vmatprep.mubr.msk.f32.mxu0 %vm2242_vm1, %v2243_v9 }
 0x58e   :  { %2084 = vmatprep.subr.bf16.mxu0 %v2241_v3 }
 0x590   :  { %1974 = vmatmul.mubr.msk.f32.vlgmr.msra.gmra.mrb[6].mxu0 %vm121_vm2, %v1820_v18 }
 0x591   :  { %2086 = vmatpush3.bf16.msra.mxu0 %v2305_v4  ;;  %1984 = vmatprep.mubr.msk.f32.mxu0 %vm2242_vm1, %v2243_v9 }
 0x592   :  { %2087 = vmatprep.subr.bf16.mxu0 %v2241_v3 }
 0x595   :  { %2089 = vmatpush3.bf16.msra.mxu0 %v2327_v11 }
 0x596   :  { %2099 = vmatprep.subr.bf16.mxu0 %v2241_v3 }
 0x65f   :  { %v555_v62 = vpop.f32.mrb[4].mxu0 }
 0x660   :  { %v629_v63 = vadd.f32 %v628_v59, %v555_v62  ;;  %v1950_v0 = vpop.f32.mrb[5].mxu0  ;;  %v1828_v62 = vld [vmem:[%s2678_s0 + $0xa] sm:$0x3] }
 0x662   :  { %v632_v1 = vadd.f32 %v2357_v17, %v629_v63 }
 0x663   :  { %v841_v22 = vpop.f32.mrb[6].mxu0 }
 0x664   :  { %2145 = vtanh.f32 %v632_v1  ;;  %v1819_v5 = vmul.f32 -1.442695, %v632_v1  ;;  %v1975_v23 = vpop.f32.mrb[7].mxu0 }
 0x666   :  { %2147 = vpow2.f32 %v1819_v5 }
 0x66e   :  { %v2146_v2 = vpop.eup %2145 }
 0x66f   :  { %642 = vrot.lane.b32.xlu1 %v2146_v2, %s2244_s22 }
 0x670   :  { %v2148_v6 = vpop.eup %2147 }
 0x671   :  { %v636_v7 = vadd.f32 1.0, %v2148_v6 }
 0x673   :  { %2149 = vrcp.f32 %v636_v7 }
 0x67d   :  { %v2150_v10 = vpop.eup %2149 }
 0x67e   :  { %v640_v14 = vmul.f32 %v2150_v10, %v437_v54 }
 0x6e1   :  { %v643_v12 = vpop.permute.xlu1 %642 }
 0x6e2   :  { %v645_v13 = vmul.f32 %v2150_v10, %v643_v12 }
 0x6e4   :  { %647 = vrot.lane.b32.xlu0 %v645_v13, %s2245_s5 }
 0x756   :  { %v648_v15 = vpop.permute.xlu0 %647 }
 0x757   :  { %v650_v16 = vadd.f32 %v648_v15, %v640_v14 }
 0x759   :  { %2151 = vtanh.f32 %v650_v16 }
 0x763   :  { %v2152_v19 = vpop.eup %2151 }
 0x764   :  { %653 = vrot.lane.b32.xlu1 %v2152_v19, %s2244_s22 }
 0x7d6   :  { %v654_v20 = vpop.permute.xlu1 %653 }
 0x7d7   :  { %v2420_v21 = vmul.f32 %v2150_v10, %v654_v20 }
 0x7d9   :  { %698 = vrot.lane.b32.xlu0 %v2420_v21, %s2245_s5 }
 0x84b   :  { %v699_v24 = vpop.permute.xlu0 %698 }
 0x84c   :  { %1967 = vmatmul.mubr.msk.f32.vlgmr.msra.gmra.mrb[6].mxu1 %vm47_vm3, %v699_v24 }
 0x84d   :  { %2092 = vmatpush3.bf16.msra.mxu1 %v2317_v8  ;;  %1991 = vmatprep.mubr.msk.f32.mxu1 %vm2242_vm1, %v2243_v9 }
 0x84e   :  { %2093 = vmatprep.subr.bf16.mxu1 %v2241_v3 }
 0x850   :  { %1992 = vmatmul.mubr.msk.f32.vlgmr.msra.gmra.mrb[8].mxu1 %vm121_vm2, %v1824_v40 }
 0x851   :  { %2095 = vmatpush3.bf16.msra.mxu1 %v2305_v4  ;;  %2002 = vmatprep.mubr.msk.f32.mxu1 %vm2242_vm1, %v2243_v9 }
 0x852   :  { %2096 = vmatprep.subr.bf16.mxu1 %v2241_v3 }
 0x855   :  { %2098 = vmatpush3.bf16.msra.mxu1 %v2327_v11 }
 0x856   :  { %2108 = vmatprep.subr.bf16.mxu1 %v2241_v3 }
 0x91f   :  { %v768_v25 = vpop.f32.mrb[6].mxu1 }
 0x920   :  { %v842_v26 = vadd.f32 %v841_v22, %v768_v25  ;;  %v1968_v27 = vpop.f32.mrb[7].mxu1 }
 0x922   :  { %v845_v28 = vadd.f32 %v2357_v17, %v842_v26  ;;  %v1832_v26 = vld [vmem:[%s2678_s0 + $0xc] sm:$0x3] }
 0x923   :  { %v1054_v44 = vpop.f32.mrb[8].mxu1 }
 0x924   :  { %2153 = vtanh.f32 %v845_v28  ;;  %v1823_v30 = vmul.f32 -1.442695, %v845_v28  ;;  %v1993_v45 = vpop.f32.mrb[9].mxu1 }
 0x926   :  { %2155 = vpow2.f32 %v1823_v30 }
 0x92e   :  { %v2154_v29 = vpop.eup %2153 }
 0x92f   :  { %855 = vrot.lane.b32.xlu1 %v2154_v29, %s2244_s22 }
 0x930   :  { %v2156_v31 = vpop.eup %2155 }
 0x931   :  { %v849_v32 = vadd.f32 1.0, %v2156_v31 }
 0x933   :  { %2157 = vrcp.f32 %v849_v32 }
 0x93d   :  { %v2158_v33 = vpop.eup %2157 }
 0x93e   :  { %v853_v36 = vmul.f32 %v2158_v33, %v650_v16 }
 0x9a1   :  { %v856_v34 = vpop.permute.xlu1 %855 }
 0x9a2   :  { %v858_v35 = vmul.f32 %v2158_v33, %v856_v34 }
 0x9a4   :  { %860 = vrot.lane.b32.xlu0 %v858_v35, %s2245_s5 }
 0xa16   :  { %v861_v38 = vpop.permute.xlu0 %860 }
 0xa17   :  { %v863_v39 = vadd.f32 %v861_v38, %v853_v36 }
 0xa19   :  { %2159 = vtanh.f32 %v863_v39 }
 0xa23   :  { %v2160_v41 = vpop.eup %2159 }
 0xa24   :  { %866 = vrot.lane.b32.xlu1 %v2160_v41, %s2244_s22 }
 0xa96   :  { %v867_v42 = vpop.permute.xlu1 %866 }
 0xa97   :  { %v2443_v43 = vmul.f32 %v2158_v33, %v867_v42 }
 0xa99   :  { %911 = vrot.lane.b32.xlu0 %v2443_v43, %s2245_s5 }
 0xb0b   :  { %v912_v46 = vpop.permute.xlu0 %911 }
 0xb0c   :  { %1985 = vmatmul.mubr.msk.f32.vlgmr.msra.gmra.mrb[8].mxu0 %vm47_vm3, %v912_v46 }
 0xb0d   :  { %2101 = vmatpush3.bf16.msra.mxu0 %v2317_v8  ;;  %2009 = vmatprep.mubr.msk.f32.mxu0 %vm2242_vm1, %v2243_v9 }
 0xb0e   :  { %2102 = vmatprep.subr.bf16.mxu0 %v2241_v3 }
 0xb10   :  { %2010 = vmatmul.mubr.msk.f32.vlgmr.msra.gmra.mrb[10].mxu0 %vm121_vm2, %v1828_v62 }
 0xb11   :  { %2104 = vmatpush3.bf16.msra.mxu0 %v2305_v4  ;;  %2020 = vmatprep.mubr.msk.f32.mxu0 %vm2242_vm1, %v2243_v9 }
 0xb12   :  { %2105 = vmatprep.subr.bf16.mxu0 %v2241_v3 }
 0xb15   :  { %2107 = vmatpush3.bf16.msra.mxu0 %v2327_v11 }
 0xb16   :  { %2117 = vmatprep.subr.bf16.mxu0 %v2241_v3 }
 0xbdf   :  { %v981_v47 = vpop.f32.mrb[8].mxu0 }
 0xbe0   :  { %v1055_v48 = vadd.f32 %v1054_v44, %v981_v47  ;;  %v1986_v49 = vpop.f32.mrb[9].mxu0  ;;  %v1836_v44 = vld [vmem:[%s2678_s0 + $0xe] sm:$0x3] }
 0xbe2   :  { %v1058_v50 = vadd.f32 %v2357_v17, %v1055_v48 }
 0xbe3   :  { %v1267_v2 = vpop.f32.mrb[10].mxu0 }
 0xbe4   :  { %2161 = vtanh.f32 %v1058_v50  ;;  %v1827_v52 = vmul.f32 -1.442695, %v1058_v50  ;;  %v2011_v5 = vpop.f32.mrb[11].mxu0 }
 0xbe6   :  { %2163 = vpow2.f32 %v1827_v52 }
 0xbee   :  { %v2162_v51 = vpop.eup %2161 }
 0xbef   :  { %1068 = vrot.lane.b32.xlu1 %v2162_v51, %s2244_s22 }
 0xbf0   :  { %v2164_v53 = vpop.eup %2163 }
 0xbf1   :  { %v1062_v54 = vadd.f32 1.0, %v2164_v53 }
 0xbf3   :  { %2165 = vrcp.f32 %v1062_v54 }
 0xbfd   :  { %v2166_v55 = vpop.eup %2165 }
 0xbfe   :  { %v1066_v59 = vmul.f32 %v2166_v55, %v863_v39 }
 0xc61   :  { %v1069_v56 = vpop.permute.xlu1 %1068 }
 0xc62   :  { %v1071_v57 = vmul.f32 %v2166_v55, %v1069_v56 }
 0xc64   :  { %1073 = vrot.lane.b32.xlu0 %v1071_v57, %s2245_s5 }
 0xcd6   :  { %v1074_v60 = vpop.permute.xlu0 %1073 }
 0xcd7   :  { %v1076_v61 = vadd.f32 %v1074_v60, %v1066_v59  ;;  %v2246_v59 = vmov 1966171168  }
 0xcd8   :  { %v232_v60 = vunpack.c.l.s4 %v2246_v59 }
 0xcd9   :  { %2167 = vtanh.f32 %v1076_v61 }
 0xce3   :  { %v2168_v63 = vpop.eup %2167 }
 0xce4   :  { %1079 = vrot.lane.b32.xlu1 %v2168_v63, %s2244_s22  ;;  %v233_v63 = vunpack.c.0.s8 %v232_v60 }
 0xd56   :  { %v1080_v0 = vpop.permute.xlu1 %1079 }
 0xd57   :  { %v2466_v1 = vmul.f32 %v2166_v55, %v1080_v0 }
 0xd59   :  { %1124 = vrot.lane.b32.xlu0 %v2466_v1, %s2245_s5 }
 0xdcb   :  { %v1125_v6 = vpop.permute.xlu0 %1124 }
 0xdcc   :  { %2003 = vmatmul.mubr.msk.f32.vlgmr.msra.gmra.mrb[10].mxu1 %vm47_vm3, %v1125_v6 }
 0xdcd   :  { %2110 = vmatpush3.bf16.msra.mxu1 %v2317_v8  ;;  %2027 = vmatprep.mubr.msk.f32.mxu1 %vm2242_vm1, %v2243_v9 }
 0xdce   :  { %2111 = vmatprep.subr.bf16.mxu1 %v2241_v3 }
 0xdd0   :  { %2028 = vmatmul.mubr.msk.f32.vlgmr.msra.gmra.mrb[12].mxu1 %vm121_vm2, %v1832_v26 }
 0xdd1   :  { %2113 = vmatpush3.bf16.msra.mxu1 %v2305_v4  ;;  %2038 = vmatprep.mubr.msk.f32.mxu1 %vm2242_vm1, %v2243_v9 }
 0xdd2   :  { %2114 = vmatprep.subr.bf16.mxu1 %v2241_v3 }
 0xdd5   :  { %2116 = vmatpush3.bf16.msra.mxu1 %v2327_v11 }
 0xe9f   :  { %v1194_v7 = vpop.f32.mrb[10].mxu1 }
 0xea0   :  { %v1268_v10 = vadd.f32 %v1267_v2, %v1194_v7  ;;  %v2004_v12 = vpop.f32.mrb[11].mxu1 }
 0xea2   :  { %v1271_v13 = vadd.f32 %v2357_v17, %v1268_v10 }
 0xea3   :  { %v1480_v30 = vpop.f32.mrb[12].mxu1 }
 0xea4   :  { %2169 = vtanh.f32 %v1271_v13  ;;  %v1831_v15 = vmul.f32 -1.442695, %v1271_v13  ;;  %v2029_v31 = vpop.f32.mrb[13].mxu1 }
 0xea6   :  { %2171 = vpow2.f32 %v1831_v15 }
 0xeae   :  { %v2170_v14 = vpop.eup %2169 }
 0xeaf   :  { %1281 = vrot.lane.b32.xlu1 %v2170_v14, %s2244_s22 }
 0xeb0   :  { %v2172_v16 = vpop.eup %2171 }
 0xeb1   :  { %v1275_v18 = vadd.f32 1.0, %v2172_v16 }
 0xeb3   :  { %2173 = vrcp.f32 %v1275_v18 }
 0xebd   :  { %v2174_v19 = vpop.eup %2173 }
 0xebe   :  { %v1279_v23 = vmul.f32 %v2174_v19, %v1076_v61  ;;  %v234_v61 = vlaneseq }
 0xec0   :  { %v235_v0 = vshrl.u32 %v234_v61, 7 }
 0xec2   :  { %v2511_v2 = vsub.s32 %v233_v63, %v235_v0  ;;  %v2521_v13 = vsub.s32 0, %v235_v0 }
 0xec4   :  { %v237_v5 = vrot.slane %v2374_v37, %v2511_v2  ;;  %v451_v10 = vrot.slane %v2397_v58, %v2511_v2  ;;  %v664_v15 = vrot.slane %v2420_v21, %v2511_v2  ;;  %v877_v58 = vrot.slane %v2443_v43, %v2511_v2 }
 0xec6   :  { %v245_v7 = vrot.slane %v237_v5, %v2511_v2  ;;  %v459_v14 = vrot.slane %v451_v10, %v2511_v2  ;;  %v672_v16 = vrot.slane %v664_v15, %v2511_v2 }
 0xec8   :  { %v256_v37 = vrot.slane %v245_v7, %v2521_v13  ;;  %v470_v18 = vrot.slane %v459_v14, %v2521_v13  ;;  %v683_v21 = vrot.slane %v672_v16, %v2521_v13 }
 0xf21   :  { %v1282_v20 = vpop.permute.xlu1 %1281 }
 0xf22   :  { %v1284_v22 = vmul.f32 %v2174_v19, %v1282_v20  ;;  %v1090_v20 = vrot.slane %v2466_v1, %v2511_v2 }
 0xf24   :  { %1286 = vrot.lane.b32.xlu0 %v1284_v22, %s2245_s5  ;;  %v1098_v22 = vrot.slane %v1090_v20, %v2511_v2 }
 0xf26   :  { %v1109_v26 = vrot.slane %v1098_v22, %v2521_v13 }
 0xf96   :  { %v1287_v24 = vpop.permute.xlu0 %1286 }
 0xf97   :  { %v1289_v25 = vadd.f32 %v1287_v24, %v1279_v23 }
 0xf99   :  { %2175 = vtanh.f32 %v1289_v25 }
 0xfa3   :  { %v2176_v27 = vpop.eup %2175 }
 0xfa4   :  { %1292 = vrot.lane.b32.xlu1 %v2176_v27, %s2244_s22 }
0x1016   :  { %v1293_v28 = vpop.permute.xlu1 %1292 }
0x1017   :  { %v2488_v29 = vmul.f32 %v2174_v19, %v1293_v28  ;;  %v885_v19 = vrot.slane %v877_v58, %v2511_v2 }
0x1019   :  { %1337 = vrot.lane.b32.xlu0 %v2488_v29, %s2245_s5  ;;  %v1303_v23 = vrot.slane %v2488_v29, %v2511_v2  ;;  %v896_v43 = vrot.slane %v885_v19, %v2521_v13 }
0x101b   :  { %v1311_v24 = vrot.slane %v1303_v23, %v2511_v2 }
0x101d   :  { %v1322_v27 = vrot.slane %v1311_v24, %v2521_v13 }
0x108b   :  { %v1338_v32 = vpop.permute.xlu0 %1337 }
0x108c   :  { %2021 = vmatmul.mubr.msk.f32.vlgmr.msra.gmra.mrb[12].mxu0 %vm47_vm3, %v1338_v32 }
0x108d   :  { %2119 = vmatpush3.bf16.msra.mxu0 %v2317_v8  ;;  %2045 = vmatprep.mubr.msk.f32.mxu0 %vm2242_vm1, %v2243_v9 }
0x1090   :  { %2046 = vmatmul.mubr.msk.f32.vlgmr.msra.gmra.mrb[14].mxu0 %vm121_vm2, %v1836_v44 }
0x115f   :  { %v1407_v3 = vpop.f32.mrb[12].mxu0 }
0x1160   :  { %v1481_v4 = vadd.f32 %v1480_v30, %v1407_v3  ;;  %v2022_v11 = vpop.f32.mrb[13].mxu0 }
0x1162   :  { %v1484_v33 = vadd.f32 %v2357_v17, %v1481_v4  ;;  %v238_v4 = vcombine.high %v237_v5, %v237_v5 }
0x1163   :  { %v1693_v48 = vpop.f32.mrb[14].mxu0 }
0x1164   :  { %2177 = vtanh.f32 %v1484_v33  ;;  %v1835_v35 = vmul.f32 -1.442695, %v1484_v33  ;;  %v2047_v49 = vpop.f32.mrb[15].mxu0 }
0x1165   :  { %v1304_v49 = vcombine.high %v1303_v23, %v1303_v23 }
0x1166   :  { %2179 = vpow2.f32 %v1835_v35 }
0x116e   :  { %v2178_v34 = vpop.eup %2177 }
0x116f   :  { %1494 = vrot.lane.b32.xlu1 %v2178_v34, %s2244_s22  ;;  %v452_v34 = vcombine.high %v451_v10, %v451_v10 }
0x1170   :  { %v2180_v36 = vpop.eup %2179 }
0x1171   :  { %v1488_v38 = vadd.f32 1.0, %v2180_v36  ;;  %v252_v36 = vrot.slane %v238_v4, %v2511_v2 }
0x1173   :  { %2181 = vrcp.f32 %v1488_v38  ;;  %v665_v38 = vcombine.high %v664_v15, %v664_v15 }
0x1175   :  { %v679_v44 = vrot.slane %v665_v38, %v2511_v2 }
0x117d   :  { %v2182_v39 = vpop.eup %2181 }
0x117e   :  { %v1492_v9 = vmul.f32 %v2182_v39, %v1289_v25 }
0x11e1   :  { %v1495_v40 = vpop.permute.xlu1 %1494 }
0x11e2   :  { %v1497_v8 = vmul.f32 %v2182_v39, %v1495_v40  ;;  %v260_v40 = vrot.slane %v252_v36, %v2521_v13 }
0x11e4   :  { %1499 = vrot.lane.b32.xlu0 %v1497_v8, %s2245_s5  ;;  %v466_v8 = vrot.slane %v452_v34, %v2511_v2 }
0x1256   :  { %v1500_v41 = vpop.permute.xlu0 %1499 }
0x1257   :  { %v2499_v42 = vadd.f32 %v1500_v41, %v1492_v9  ;;  %v878_v9 = vcombine.high %v877_v58, %v877_v58 }
0x1259   :  { %2183 = vtanh.f32 %v2499_v42 }
0x1263   :  { %v2184_v45 = vpop.eup %2183 }
0x1264   :  { %1505 = vrot.lane.b32.xlu1 %v2184_v45, %s2244_s22  ;;  %v1091_v45 = vcombine.high %v1090_v20, %v1090_v20 }
0x12d6   :  { %v1506_v46 = vpop.permute.xlu1 %1505 }
0x12d7   :  { %v1508_v47 = vmul.f32 %v2182_v39, %v1506_v46 }
0x12d9   :  { %1550 = vrot.lane.b32.xlu0 %v1508_v47, %s2245_s5  ;;  %v1516_v25 = vrot.slane %v1508_v47, %v2511_v2  ;;  %v687_v47 = vrot.slane %v679_v44, %v2521_v13 }
0x12db   :  { %v1524_v1 = vrot.slane %v1516_v25, %v2511_v2 }
0x12dd   :  { %v1535_v28 = vrot.slane %v1524_v1, %v2521_v13 }
0x134b   :  { %v1551_v50 = vpop.permute.xlu0 %1550 }
0x134c   :  { %2039 = vmatmul.mubr.msk.f32.vlgmr.msra.gmra.mrb[14].mxu1 %vm47_vm3, %v1551_v50 }
0x141f   :  { %v1620_v51 = vpop.f32.mrb[14].mxu1 }
0x1420   :  { %v1694_v52 = vadd.f32 %v1693_v48, %v1620_v51  ;;  %v2040_v53 = vpop.f32.mrb[15].mxu1  ;;  %v892_v48 = vrot.slane %v878_v9, %v2511_v2  ;;  %v1105_v51 = vrot.slane %v1091_v45, %v2511_v2 }
0x1422   :  { %v1697_v54 = vadd.f32 %v2357_v17, %v1694_v52  ;;  %v900_v50 = vrot.slane %v892_v48, %v2521_v13  ;;  %v1517_v52 = vcombine.high %v1516_v25, %v1516_v25  ;;  %v1113_v53 = vrot.slane %v1105_v51, %v2521_v13 }
0x1424   :  { %2185 = vtanh.f32 %v1697_v54  ;;  %v1839_v56 = vmul.f32 -1.442695, %v1697_v54  ;;  %v1318_v54 = vrot.slane %v1304_v49, %v2511_v2 }
0x1426   :  { %2187 = vpow2.f32 %v1839_v56  ;;  %v1531_v56 = vrot.slane %v1517_v52, %v2511_v2 }
0x142e   :  { %v2186_v55 = vpop.eup %2185 }
0x142f   :  { %1707 = vrot.lane.b32.xlu1 %v2186_v55, %s2244_s22  ;;  %v1326_v55 = vrot.slane %v1318_v54, %v2521_v13 }
0x1430   :  { %v2188_v57 = vpop.eup %2187 }
0x1431   :  { %v1701_v62 = vadd.f32 1.0, %v2188_v57  ;;  %v1539_v57 = vrot.slane %v1531_v56, %v2521_v13 }
0x1433   :  { %2189 = vrcp.f32 %v1701_v62 }
0x143d   :  { %v2515_v17 = vpop.eup %2189 }
0x143e   :  { %v1705_v29 = vmul.f32 %v2515_v17, %v2499_v42  ;;  %v474_v42 = vrot.slane %v466_v8, %v2521_v13 }
0x14a1   :  { %v1708_v6 = vpop.permute.xlu1 %1707 }
0x14a2   :  { %v1710_v12 = vmul.f32 %v2515_v17, %v1708_v6 }
0x14a4   :  { %1712 = vrot.lane.b32.xlu0 %v1710_v12, %s2245_s5 }
0x14a8   :  { %261 = vrot.lane.b32.xlu0 %v256_v37, %s2245_s5 }
0x14ac   :  { %475 = vrot.lane.b32.xlu0 %v470_v18, %s2245_s5 }
0x14b0   :  { %688 = vrot.lane.b32.xlu0 %v683_v21, %s2245_s5 }
0x14b4   :  { %901 = vrot.lane.b32.xlu0 %v896_v43, %s2245_s5 }
0x14b8   :  { %1114 = vrot.lane.b32.xlu0 %v1109_v26, %s2245_s5 }
0x14bc   :  { %1327 = vrot.lane.b32.xlu0 %v1322_v27, %s2245_s5 }
0x14c0   :  { %1540 = vrot.lane.b32.xlu0 %v1535_v28, %s2245_s5 }
0x1516   :  { %v1713_v30 = vpop.permute.xlu0 %1712 }
0x1517   :  { %v1715_v31 = vadd.f32 %v1713_v30, %v1705_v29 }
0x1519   :  { %2191 = vtanh.f32 %v1715_v31 }
0x151a   :  { %v262_v32 = vpop.permute.xlu0 %261 }
0x151b   :  { %268 = vst.msk [vmem:[%s2684_s6] sm:$0x1] %vm267_vm4, %v262_v32 }
0x151e   :  { %v476_v3 = vpop.permute.xlu0 %475 }
0x151f   :  { %481 = vst.msk [vmem:[%s2684_s6 + $0x1] sm:$0x1] %vm267_vm4, %v476_v3 }
0x1522   :  { %v689_v11 = vpop.permute.xlu0 %688 }
0x1523   :  { %v2192_v33 = vpop.eup %2191  ;;  %694 = vst.msk [vmem:[%s2684_s6 + $0x2] sm:$0x1] %vm267_vm4, %v689_v11 }
0x1524   :  { %1718 = vrot.lane.b32.xlu1 %v2192_v33, %s2244_s22 }
0x1526   :  { %v902_v35 = vpop.permute.xlu0 %901 }
0x1527   :  { %907 = vst.msk [vmem:[%s2684_s6 + $0x3] sm:$0x1] %vm267_vm4, %v902_v35 }
0x1528   :  { %1767 = vrot.lane.b32.xlu1 %v1715_v31, %s2247_s4 }
0x152a   :  { %v1115_v39 = vpop.permute.xlu0 %1114 }
0x152b   :  { %1120 = vst.msk [vmem:[%s2684_s6 + $0x4] sm:$0x1] %vm267_vm4, %v1115_v39 }
0x152c   :  { %263 = vrot.lane.b32.xlu1 %v260_v40, %s2245_s5 }
0x152e   :  { %v1328_v41 = vpop.permute.xlu0 %1327 }
0x152f   :  { %1333 = vst.msk [vmem:[%s2684_s6 + $0x5] sm:$0x1] %vm267_vm4, %v1328_v41 }
0x1530   :  { %477 = vrot.lane.b32.xlu1 %v474_v42, %s2245_s5 }
0x1532   :  { %v1541_v46 = vpop.permute.xlu0 %1540 }
0x1533   :  { %1546 = vst.msk [vmem:[%s2684_s6 + $0x6] sm:$0x1] %vm267_vm4, %v1541_v46 }
0x1534   :  { %690 = vrot.lane.b32.xlu1 %v687_v47, %s2245_s5 }
0x1538   :  { %903 = vrot.lane.b32.xlu1 %v900_v50, %s2245_s5 }
0x153c   :  { %1116 = vrot.lane.b32.xlu1 %v1113_v53, %s2245_s5 }
0x1540   :  { %1329 = vrot.lane.b32.xlu1 %v1326_v55, %s2245_s5 }
0x1544   :  { %1542 = vrot.lane.b32.xlu1 %v1539_v57, %s2245_s5 }
0x1596   :  { %v1719_v59 = vpop.permute.xlu1 %1718 }
0x1597   :  { %v1721_v60 = vmul.f32 %v2515_v17, %v1719_v59 }
0x1599   :  { %v1729_v61 = vrot.slane %v1721_v60, %v2511_v2  ;;  %1761 = vrot.lane.b32.xlu0 %v1721_v60, %s2245_s5 }
0x159a   :  { %v1768_v62 = vpop.permute.xlu1 %1767 }
0x159b   :  { %v1730_v63 = vcombine.high %v1729_v61, %v1729_v61  ;;  %v1737_v0 = vrot.slane %v1729_v61, %v2511_v2  ;;  %1770 = vst.msk [vmem:[#allocation3] sm:$0x3] %vm33_vm0, %v1768_v62  ;;  %1775 = vst.msk [vmem:[#allocation6] sm:$0x3] %vm33_vm0, %v1768_v62 }
0x159c   :  { %2204 = shalt.err (!%p2201_p4)
}
0x159d   :  { %s2205_s29 = scalar_lea.hbm %s2686_s8, 32 }
0x159e   :  { %p2206_p5 = scmp.ne.s32.totalorder %s2686_s8, %s2205_s29  ;;  %p2209_p6 = scmp.lt.u32.totalorder %s2205_s29, %s2686_s8 }
0x15a0   :  { %p2211_p7 = pnand %p2209_p6, %p2206_p5 }
0x15a2   :  { %2214 = shalt.err (!%p2211_p7)
}
0x15a3   :  { %1797 = dma.vmem_to_hbm [thread:$0]  %s1795_s25, 32, %s2686_s8, [#allocation7]   ;;  %v1748_v5 = vrot.slane %v1737_v0, %v2521_v13  ;;  %v1744_v17 = vrot.slane %v1730_v63, %v2511_v2  ;;  %v264_v6 = vpop.permute.xlu1 %263 }
0x15a4   :  { %269 = vst.msk [vmem:[%s2684_s6 + $0x8] sm:$0x1] %vm267_vm4, %v264_v6  ;;  %s2249_s22 = smov [#allocation4]  }
0x15a5   :  { %1753 = vrot.lane.b32.xlu0 %v1748_v5, %s2245_s5  ;;  %v1752_v7 = vrot.slane %v1744_v17, %v2521_v13  ;;  %s1784_s3 = sshll.u32 %s2249_s22, 4  ;;  %s1785_s3 = int_to_ptr.vmem [resolvable:$true] %s1784_s3 }
0x15a6   :  { %s2215_s23 = scalar_lea.vmem %s1785_s3, 32  ;;  %p2220_p9 = scmp.lt.s32.totalorder %s1785_s3, %s1785_s3 }
0x15a7   :  { %1755 = vrot.lane.b32.xlu1 %v1752_v7, %s2245_s5  ;;  %v478_v10 = vpop.permute.xlu1 %477  ;;  %p2216_p8 = scmp.ne.s32.totalorder %s1785_s3, %s2215_s23  ;;  %p2221_p10 = scmp.lt.s32.totalorder %s2215_s23, %s2215_s23 }
0x15a8   :  { %482 = vst.msk [vmem:[%s2684_s6 + $0x9] sm:$0x1] %vm267_vm4, %v478_v10 }
0x15a9   :  { %p2222_p11 = por %p2221_p10, %p2220_p9 }
0x15ab   :  { %v691_v12 = vpop.permute.xlu1 %690  ;;  %p2223_p12 = pnand %p2222_p11, %p2216_p8 }
0x15ac   :  { %695 = vst.msk [vmem:[%s2684_s6 + $0xa] sm:$0x1] %vm267_vm4, %v691_v12 }
0x15af   :  { %v904_v2 = vpop.permute.xlu1 %903 }
0x15b0   :  { %908 = vst.msk [vmem:[%s2684_s6 + $0xb] sm:$0x1] %vm267_vm4, %v904_v2 }
0x15b3   :  { %v1117_v13 = vpop.permute.xlu1 %1116 }
0x15b4   :  { %1121 = vst.msk [vmem:[%s2684_s6 + $0xc] sm:$0x1] %vm267_vm4, %v1117_v13 }
0x15b7   :  { %v1330_v14 = vpop.permute.xlu1 %1329 }
0x15b8   :  { %1334 = vst.msk [vmem:[%s2684_s6 + $0xd] sm:$0x1] %vm267_vm4, %v1330_v14 }
0x15bb   :  { %v1543_v15 = vpop.permute.xlu1 %1542 }
0x15bc   :  { %1547 = vst.msk [vmem:[%s2684_s6 + $0xe] sm:$0x1] %vm267_vm4, %v1543_v15 }
0x160b   :  { %v1762_v37 = vpop.permute.xlu0 %1761 }
0x160c   :  { %1765 = vst.msk [vmem:[#allocation2] sm:$0x3] %vm33_vm0, %v1762_v37  ;;  %1774 = vst.msk [vmem:[#allocation4] sm:$0x3] %vm33_vm0, %v1762_v37 }
0x160d   :  { %2226 = shalt.err (!%p2223_p12)
}
0x160e   :  { %s2227_s26 = scalar_lea.hbm %s2685_s7, 32 }
0x160f   :  { %p2228_p13 = scmp.ne.s32.totalorder %s2685_s7, %s2227_s26  ;;  %p2231_p0 = scmp.lt.u32.totalorder %s2227_s26, %s2685_s7 }
0x1611   :  { %p2233_p1 = pnand %p2231_p0, %p2228_p13 }
0x1613   :  { %2236 = shalt.err (!%p2233_p1)
}
0x1614   :  { %1787 = dma.vmem_to_hbm [thread:$0]  %s1785_s3, 32, %s2685_s7, [#allocation5]  }
0x1617   :  { %v1754_v16 = vpop.permute.xlu0 %1753 }
0x1618   :  { %1759 = vst.msk [vmem:[%s2684_s6 + $0x7] sm:$0x1] %vm267_vm4, %v1754_v16 }
0x1619   :  { %v1756_v58 = vpop.permute.xlu1 %1755 }
0x161a   :  { %1760 = vst.msk [vmem:[%s2684_s6 + $0xf] sm:$0x1] %vm267_vm4, %v1756_v58 }
0x161b   :  { %2237 = dma.done.wait [#allocation5], 32  }
0x161c   :  { %2238 = vsyncadd [#allocation5], 4294967264 }
0x161d   :  { %2239 = dma.done.wait [#allocation7], 32  }
0x161e   :  { %2240 = vsyncadd [#allocation7], 4294967264 }
0x161f   :  { %1806 = vsyncpa [#allocation5], 1 }
0x1620   :  { %1807 = vsyncpa [#allocation7], 1 }

</bundles_post_ra>
